<compile_context>
chip_gen: v7x
topology: tpu7x:2x2x1
jax: 0.10.0
libtpu: 0.0.40
codegen_flags: <defaults>
</compile_context>

<pallas_src>
import functools

import jax
import jax.numpy as jnp
from jax.experimental import pallas as pl
from jax.experimental.pallas import tpu as pltpu


# ----------------------------------------------------------------------------
# Kernel 1: prediction preprocessing (elementwise + class reduce, lane-dense out)
# ----------------------------------------------------------------------------
def preprocess_kernel(pred_ref, det_ref, *, nc):
    p = pred_ref[0]                              # (TN, C)
    xy = p[:, 0:2]                               # (cx, cy)
    half_wh = 0.5 * p[:, 2:4]                    # (0.5*w, 0.5*h)
    conf = p[:, 4:5]
    scores = p[:, 5:5 + nc] * conf               # (TN, nc)  "scores *= conf"

    # boxes @ convert_matrix with the constants inlined:
    #   [[1,0,1,0],[0,1,0,1],[-.5,0,.5,0],[0,-.5,0,.5]]
    xy1 = xy - half_wh                           # (x1, y1)
    xy2 = xy + half_wh                           # (x2, y2)

    # max over classes (keepdim) + first-argmax (category id)
    max_score = jnp.max(scores, axis=1, keepdims=True)           # (TN, 1)
    ids = jax.lax.broadcasted_iota(jnp.int32, scores.shape, 1)
    cat = jnp.min(jnp.where(scores >= max_score, ids, nc), axis=1, keepdims=True)

    zero = jnp.zeros_like(max_score)
    fused = jnp.concatenate(
        [xy1, xy2, cat.astype(jnp.float32), max_score, zero, zero], axis=1)
    det_ref[0] = fused.T                         # (8, TN): lane axis = anchors (dense)


def _pick_tile_n(n, preferred=512):
    # full-extent blocks are always legal; otherwise keep last dim a multiple of 128
    if n <= preferred:
        return n
    for t in (preferred, 256, 128):
        if n % t == 0:
            return t
    return preferred   # rely on cdiv grid + masked partial final tile


def run_preprocess(pred, *, nc, tile_n=None):
    B, N, C = pred.shape
    tn = tile_n or _pick_tile_n(N)
    grid = (B, pl.cdiv(N, tn))

    kernel = functools.partial(preprocess_kernel, nc=nc)
    return pl.pallas_call(
        kernel,
        out_shape=jax.ShapeDtypeStruct((B, 8, N), jnp.float32),
        grid_spec=pltpu.PrefetchScalarGridSpec(
            num_scalar_prefetch=0,
            grid=grid,
            in_specs=[pl.BlockSpec((1, tn, C), lambda b, i: (b, i, 0))],
            out_specs=pl.BlockSpec((1, 8, tn), lambda b, i: (b, 0, i)),
        ),
        compiler_params=pltpu.CompilerParams(
            dimension_semantics=("parallel", "parallel")),
    )(pred)


# ----------------------------------------------------------------------------
# Kernel 2: masks = sigmoid(coef @ proto[b]) cropped to downscaled boxes,
#           batched over all selected objects, one grid step per batch image.
# ----------------------------------------------------------------------------
def mask_kernel(coef_ref, box_ref, xidx_ref, proto_ref, r_ref, c_ref, out_ref,
                *, pooler_scale):
    b = pl.program_id(0)

    @pl.when(b == 0)
    def _():
        out_ref[...] = jnp.zeros_like(out_ref)

    m = jnp.dot(coef_ref[...], proto_ref[0],
                preferred_element_type=jnp.float32)              # (T_pad, HW)
    m = jax.nn.sigmoid(m)                                        # EUP exp/recip

    box = box_ref[...] * jnp.float32(pooler_scale)               # (T_pad, 4)
    x1, y1 = box[:, 0:1], box[:, 1:2]
    x2, y2 = box[:, 2:3], box[:, 3:4]

    r = r_ref[...]                                               # (1, HW) column (x)
    c = c_ref[...]                                               # (1, HW) row (y)
    crop = (r >= x1) & (r < x2) & (c >= y1) & (c < y2)           # (T_pad, HW)
    keep = xidx_ref[...] == b                                    # (T_pad, 1)

    # each row belongs to exactly one batch image: select-overwrite (no read-add)
    out_ref[...] = jnp.where(keep & crop, m, out_ref[...])


def run_masks(x_idx, sel_coef, sel_boxes, proto_flat, *, pooler_scale,
              proto_h, proto_w):
    B, NM, HW = proto_flat.shape
    T = sel_coef.shape[0]
    T_pad = max(8, ((T + 7) // 8) * 8)
    pad = T_pad - T

    coef_p = jnp.pad(sel_coef, ((0, pad), (0, 0)))
    boxes_p = jnp.pad(sel_boxes, ((0, pad), (0, 0)))
    xcol = jnp.pad(x_idx.astype(jnp.int32), (0, pad), constant_values=-1)[:, None]

    # flat crop coordinates, built once on host side (avoids in-kernel div/mod)
    r_row = jnp.tile(jnp.arange(proto_w, dtype=jnp.float32), proto_h)[None, :]
    c_row = jnp.repeat(jnp.arange(proto_h, dtype=jnp.float32), proto_w)[None, :]

    kernel = functools.partial(mask_kernel, pooler_scale=pooler_scale)
    out = pl.pallas_call(
        kernel,
        out_shape=jax.ShapeDtypeStruct((T_pad, HW), jnp.float32),
        grid_spec=pltpu.PrefetchScalarGridSpec(
            num_scalar_prefetch=0,
            grid=(B,),
            in_specs=[
                pl.BlockSpec((T_pad, NM), lambda b: (0, 0)),
                pl.BlockSpec((T_pad, 4), lambda b: (0, 0)),
                pl.BlockSpec((T_pad, 1), lambda b: (0, 0)),
                pl.BlockSpec((1, NM, HW), lambda b: (b, 0, 0)),
                pl.BlockSpec((1, HW), lambda b: (0, 0)),
                pl.BlockSpec((1, HW), lambda b: (0, 0)),
            ],
            out_specs=pl.BlockSpec((T_pad, HW), lambda b: (0, 0)),
        ),
        compiler_params=pltpu.CompilerParams(
            dimension_semantics=("arbitrary",)),   # output resident across batch axis
    )(coef_p, boxes_p, xcol, proto_flat, r_row, c_row)
    return out[:T]                                 # (T, H*W)


# ----------------------------------------------------------------------------
# Full forward (glue in plain JAX)
# ----------------------------------------------------------------------------
def onnx_ort_forward(pred, proto, *, nc=80, max_wh=640, pooler_scale=0.25,
                     num_det=16, nms_key=None):
    del max_wh  # only used to build nmsbox, which only feeds the placeholder NMS
    B, N, C = pred.shape
    _, NM, H, W = proto.shape
    assert C == 5 + nc + NM

    det = run_preprocess(pred, nc=nc)                   # (B, 8, N)

    # --- deterministic stand-in for the random ORT_NMS placeholder ---
    if nms_key is None:
        nms_key = jax.random.PRNGKey(42)
    X = jnp.sort(jax.random.randint(nms_key, (num_det,), 0, B)).astype(jnp.int32)
    Y = jnp.arange(100, 100 + num_det, dtype=jnp.int32)

    sel = det[X, :, Y]                                  # (T, 8)
    selected_boxes = sel[:, 0:4]                        # (T, 4)
    selected_categories = sel[:, 4:5]                   # (T, 1) float
    selected_scores = sel[:, 5:6]                       # (T, 1)
    selected_mask = pred[X, Y, 5 + nc:5 + nc + NM]      # (T, NM)

    proto_flat = proto.reshape(B, NM, H * W)
    masks = run_masks(X, selected_mask, selected_boxes, proto_flat,
                      pooler_scale=pooler_scale, proto_h=H, proto_w=W)   # (T, H*W)

    Xf = X.astype(jnp.float32)[:, None]                 # (T, 1)
    return jnp.concatenate(
        [Xf, selected_boxes, selected_categories, selected_scores, masks], axis=1)


if __name__ == "__main__":
    B, N = 2, 256
    NC, NM, H, W = 80, 32, 16, 16
    C = 5 + NC + NM

    key = jax.random.PRNGKey(0)
    k_pred, k_proto = jax.random.split(key)
    pred = jax.random.normal(k_pred, (B, N, C), dtype=jnp.float32)
    # make confidences / scores positive-ish like sigmoided logits
    pred = pred.at[:, :, 4:5 + NC].set(jax.nn.sigmoid(pred[:, :, 4:5 + NC]))
    # make boxes look like (cx, cy, w, h) in pixels
    pred = pred.at[:, :, 0:4].set(
        jnp.abs(pred[:, :, 0:4]) * jnp.array([320.0, 320.0, 64.0, 64.0]))
    proto = jax.random.normal(k_proto, (B, NM, H, W), dtype=jnp.float32)

    out = onnx_ort_forward(pred, proto, nc=NC, max_wh=640, pooler_scale=0.25,
                           num_det=16)
    out = jax.block_until_ready(out)
    assert out.shape == (16, 1 + 4 + 1 + 1 + H * W)
    print("KERNEL_OK")
</pallas_src>

<mosaic_0001>
module attributes {stable_mosaic.version = 11 : i64} {
  func.func @preprocess_kernel(%arg0: i32, %arg1: i32, %arg2: memref<1x256x117xf32, #tpu.memory_space<vmem>>, %arg3: memref<1x8x256xf32, #tpu.memory_space<vmem>>) attributes {dimension_semantics = [#tpu.dimension_semantics<parallel>, #tpu.dimension_semantics<parallel>], iteration_bounds = array<i64: 2, 1>, scalar_prefetch = 0 : i64, scratch_operands = 0 : i64, tpu.core_type = #tpu.core_type<tc>, window_params = [{transform_indices = @transform_0, window_bounds = array<i64: 1, 256, 117>}, {transform_indices = @transform_1, window_bounds = array<i64: 1, 8, 256>}]} {
    %c0 = arith.constant 0 : index
    %c0_0 = arith.constant 0 : index
    %c0_1 = arith.constant 0 : index
    %0 = vector.load %arg2[%c0, %c0_0, %c0_1] : memref<1x256x117xf32, #tpu.memory_space<vmem>>, vector<1x256x117xf32>
    %1 = vector.shape_cast %0 : vector<1x256x117xf32> to vector<256x117xf32>
    %2 = vector.extract_strided_slice %1 {offsets = [0, 0], sizes = [256, 2], strides = [1, 1]} : vector<256x117xf32> to vector<256x2xf32>
    %3 = vector.extract_strided_slice %1 {offsets = [0, 2], sizes = [256, 2], strides = [1, 1]} : vector<256x117xf32> to vector<256x2xf32>
    %cst = arith.constant 5.000000e-01 : f32
    %4 = vector.broadcast %cst : f32 to vector<256x2xf32>
    %5 = arith.mulf %4, %3 : vector<256x2xf32>
    %6 = vector.extract_strided_slice %1 {offsets = [0, 4], sizes = [256, 1], strides = [1, 1]} : vector<256x117xf32> to vector<256x1xf32>
    %7 = vector.extract_strided_slice %1 {offsets = [0, 5], sizes = [256, 80], strides = [1, 1]} : vector<256x117xf32> to vector<256x80xf32>
    %8 = vector.broadcast %6 : vector<256x1xf32> to vector<256x80xf32>
    %9 = arith.mulf %7, %8 : vector<256x80xf32>
    %10 = arith.subf %2, %5 : vector<256x2xf32>
    %11 = arith.addf %2, %5 : vector<256x2xf32>
    %cst_2 = arith.constant dense<0xFF800000> : vector<256xf32>
    %12 = vector.multi_reduction <maximumf>, %9, %cst_2 [1] : vector<256x80xf32> to vector<256xf32>
    %13 = vector.shape_cast %12 : vector<256xf32> to vector<256x1xf32>
    %14 = tpu.iota {dimensions = array<i32: 1>} : vector<256x80xi32>
    %15 = vector.broadcast %13 : vector<256x1xf32> to vector<256x80xf32>
    %16 = arith.cmpf oge, %9, %15 : vector<256x80xf32>
    %c80_i32 = arith.constant 80 : i32
    %17 = vector.broadcast %c80_i32 : i32 to vector<256x80xi32>
    %18 = arith.select %16, %14, %17 : vector<256x80xi1>, vector<256x80xi32>
    %cst_3 = arith.constant dense<2147483647> : vector<256xi32>
    %19 = vector.multi_reduction <minsi>, %18, %cst_3 [1] : vector<256x80xi32> to vector<256xi32>
    %20 = vector.shape_cast %19 : vector<256xi32> to vector<256x1xi32>
    %cst_4 = arith.constant 0.000000e+00 : f32
    %21 = vector.broadcast %cst_4 : f32 to vector<256x1xf32>
    %22 = arith.sitofp %20 : vector<256x1xi32> to vector<256x1xf32>
    %23 = tpu.concatenate %10, %11, %22, %13, %21, %21 in 1 : vector<256x2xf32>, vector<256x2xf32>, vector<256x1xf32>, vector<256x1xf32>, vector<256x1xf32>, vector<256x1xf32> -> vector<256x8xf32>
    %24 = tpu.transpose %23, [1, 0] : vector<256x8xf32> -> vector<8x256xf32>
    %c0_5 = arith.constant 0 : index
    %c0_6 = arith.constant 0 : index
    %c0_7 = arith.constant 0 : index
    %25 = vector.load %arg3[%c0_5, %c0_6, %c0_7] : memref<1x8x256xf32, #tpu.memory_space<vmem>>, vector<1x8x256xf32>
    %26 = vector.shape_cast %25 : vector<1x8x256xf32> to vector<8x256xf32>
    %27 = vector.shape_cast %24 : vector<8x256xf32> to vector<1x8x256xf32>
    tpu.vector_store %arg3[%c0_5, %c0_6, %c0_7], %27 {strides = array<i32>} : memref<1x8x256xf32, #tpu.memory_space<vmem>>, vector<1x8x256xf32>,
    return
  }
  func.func @transform_0(%arg0: i32, %arg1: i32) -> (i32, i32, i32) {
    %c0_i32 = arith.constant 0 : i32
    %c0_i32_0 = arith.constant 0 : i32
    return %arg0, %arg1, %c0_i32 : i32, i32, i32
  }
  func.func @transform_1(%arg0: i32, %arg1: i32) -> (i32, i32, i32) {
    %c0_i32 = arith.constant 0 : i32
    %c0_i32_0 = arith.constant 0 : i32
    return %arg0, %c0_i32, %arg1 : i32, i32, i32
  }
}

</mosaic_0001>

<bundles_post_ra>
// kernel: tpu_custom_call.1
= control target key start
LH: loop header
LB: loop body
LE: loop exit
PB: predicated region body
PF: predicated region fallthrough
CT: control target
= control target key end

     0   :  { %6 = vsyncpa [#allocation3], 0  ;;  %s3581_s0 = inlined_call_operand.vmem [shape: f32[2,256,117], index: 0, kind: input, shape index: {}]   ;;  %s3582_s1 = inlined_call_operand.hbm [shape: f32[2,8,256], index: 1, kind: output, shape index: {}]  }
   0x1   :  { %8 = vsyncpa [#allocation3 + $0x1], 0  ;;  %s1926_s6 = smov 0   ;;  %s1928_s7 = smov 0  }
   0x2   :  { %s1930_s8 = smov 0   ;;  %s1932_s9 = smov 0  }
   0x3   :  { %s1934_s10 = smov 0   ;;  %s1936_s11 = smov 0  }
   0x4 LB: > { %s1723_s12 = sadd.s32 4294967295, %s1909_s11   ;;  %s1724_s13 = sadd.s32 4294967294, %s1909_s11   ;;  %s1909_s11 = sphi %s1936_s11, %s14_s11   ;;  %s1905_s10 = sphi %s1934_s10, %s3966_s10   ;;  %s1901_s9 = sphi %s1932_s9, %s3965_s9   ;;  %s1897_s8 = sphi %s1930_s8, %s3964_s8   ;;  %s1893_s7 = sphi %s1928_s7, %s3963_s7   ;;  %s1889_s6 = sphi %s1926_s6, %s3962_s6  }
   0x5   : > { %s26_s14 = sadd.s32 1, %s1905_s10  ;;  %s63_s15 = sadd.s32 1, %s1897_s8 }
   0x6   : > { %p28_p0 = scmp.ge.s32.totalorder %s26_s14, 2  ;;  %p73_p1 = scmp.ne.s32.totalorder %s1897_s8, %s1893_s7 }
   0x7   : > { %p74_p2 = scmp.eq.s32.totalorder %s1723_s12, 1  ;;  %p79_p3 = scmp.ne.s32.totalorder %s1893_s7, %s1889_s6 }
   0x8   : > { %s3968_s14 = smov (%p28_p0, %s26_s14), 0  ;;  %p80_p5 = scmp.eq.s32.totalorder %s1724_s13, 1 }
   0x9   : > { %p1966_p4 = por %p74_p2, %p73_p1  ;;  %s58_s17 = ssub.s32 %s1905_s10, %s3968_s14 }
   0xa   : > { %p1727_p6 = scmp.ge.s32.totalorder %s1909_s11, 1  ;;  %p61_p7 = scmp.eq.s32.totalorder %s58_s17, 0 }
   0xb   : > { %p1973_p8 = por %p80_p5, %p79_p3  ;;  %p111_p9 = scmp.lt.s32.totalorder %s1909_s11, 3 }
   0xc   : > { %s1979_s19 = scalar_select %p61_p7, %s1897_s8, %s63_s15  }
   0xd   : > { %p112_p10 = pnand %p1727_p6, %p111_p9 }
   0xf   : > { %115 = sbr.rel (%p112_p10) target bundleno = 902 (0x386), region = 24 }
  0x16   : > { %p136_p11 = scmp.lt.s32.totalorder %s1901_s9, 1  ;;  %v1911_v0 = vmov 4   ;;  %s1912_s25 = smov 126   ;;  %vm594_vm0 = vcmask 695336  }
  0x17   : > { %1798 = vset.pattern.permute.xlu1 %v1911_v0  ;;  %1797 = vset.pattern.permute.xlu0 %v1911_v0  ;;  %s1913_s26 = smov 5   ;;  %s1914_s27 = smov 2  }
  0x18   : > { %s137_s20 = scalar_select %p136_p11, %s1901_s9, 1 }
  0x19   : > { %s132_s28 = sand.u32 1, %s1893_s7   ;;  %s1737_s3 = sshll.u32 %s1901_s9, 8 }
  0x1a   : > { %s1736_s21 = sshll.u32 %s137_s20, 8  ;;  %s1728_s29 = sshll.u32 %s132_s28, 4 }
  0x1b   : > { %s1986_s24 = scalar_lea.vmem %s3581_s0, %s1736_s21  ;;  %s134_s30 = scalar_lea.vmem [#allocation2], %s1728_s29 }
  0x1c   : > { %v1989_v1 = vld [vmem:[%s1986_s24 + $0x10] sm:$0xff]  ;;  %v1992_v2 = vld [vmem:[%s1986_s24] sm:$0xff]  ;;  %v1997_v3 = vld [vmem:[%s1986_s24 + $0x18] sm:$0xff]  ;;  %s1647_s2 = sshll.u32 %s134_s30, 4  ;;  %s3536_s12 = scalar_lea.hbm %s3582_s1, %s1737_s3  ;;  %s3531_s2 = int_to_ptr.vmem [resolvable:$true] %s1647_s2 }
  0x1d   : > { %222 = vperm.xlu1 %1798, %v1989_v1   ;;  %212 = vperm.xlu0 %1797, %v1992_v2   ;;  %v2000_v4 = vld [vmem:[%s1986_s24 + $0x8] sm:$0xff]  ;;  %v2008_v6 = vld [vmem:[%s1986_s24 + $0x20] sm:$0xff]  ;;  %v2013_v7 = vld [vmem:[%s1986_s24 + $0x38] sm:$0xff]  ;;  %v178_v34 = vmul.f32 0.5, %v1992_v2  ;;  %v181_v35 = vmul.f32 0.5, %v1997_v3  ;;  %v180_v36 = vmul.f32 0.5, %v1989_v1 }
  0x1e   : > { %v2005_v5 = vld [vmem:[%s1986_s24 + $0x28] sm:$0xff]  ;;  %v2016_v8 = vld [vmem:[%s1986_s24 + $0x30] sm:$0xff]  ;;  %v2024_v10 = vld [vmem:[%s1986_s24 + $0x40] sm:$0xff]  ;;  %v179_v33 = vmul.f32 0.5, %v2000_v4  ;;  %v182_v38 = vmul.f32 0.5, %v2008_v6  ;;  %v185_v39 = vmul.f32 0.5, %v2013_v7 }
  0x1f   : > { %v2021_v9 = vld [vmem:[%s1986_s24 + $0x48] sm:$0xff]  ;;  %v2029_v11 = vld [vmem:[%s1986_s24 + $0x58] sm:$0xff]  ;;  %v2032_v12 = vld [vmem:[%s1986_s24 + $0x50] sm:$0xff]  ;;  %v183_v37 = vmul.f32 0.5, %v2005_v5  ;;  %v184_v40 = vmul.f32 0.5, %v2016_v8  ;;  %v186_v42 = vmul.f32 0.5, %v2024_v10 }
  0x20   : > { %v2037_v13 = vld [vmem:[%s1986_s24 + $0x68] sm:$0xff]  ;;  %v2040_v14 = vld [vmem:[%s1986_s24 + $0x60] sm:$0xff]  ;;  %v2045_v15 = vld [vmem:[%s1986_s24 + $0x78] sm:$0xff]  ;;  %v187_v41 = vmul.f32 0.5, %v2021_v9  ;;  %v189_v43 = vmul.f32 0.5, %v2029_v11  ;;  %v188_v44 = vmul.f32 0.5, %v2032_v12 }
  0x21   : > { %227 = vperm.xlu1 %1798, %v1997_v3   ;;  %217 = vperm.xlu0 %1797, %v2000_v4   ;;  %v2048_v16 = vld [vmem:[%s1986_s24 + $0x70] sm:$0xff]  ;;  %v2053_v17 = vld [vmem:[%s1986_s24 + $0x88] sm:$0xff]  ;;  %v2056_v18 = vld [vmem:[%s1986_s24 + $0x80] sm:$0xff]  ;;  %v191_v45 = vmul.f32 0.5, %v2037_v13  ;;  %v190_v46 = vmul.f32 0.5, %v2040_v14  ;;  %v193_v47 = vmul.f32 0.5, %v2045_v15 }
  0x22   : > { %3702 = vst [vmem:[#allocation5_spill] sm:$0xff] %v2053_v17  ;;  %3703 = vst [vmem:[#allocation6_spill] sm:$0xff] %v2056_v18  ;;  %v2061_v19 = vld [vmem:[%s1986_s24 + $0x98] sm:$0xff]  ;;  %v2064_v20 = vld [vmem:[%s1986_s24 + $0x90] sm:$0xff]  ;;  %v192_v48 = vmul.f32 0.5, %v2048_v16  ;;  %v195_v49 = vmul.f32 0.5, %v2053_v17 }
  0x23   : > { %3704 = vst [vmem:[#allocation7_spill] sm:$0xff] %v2061_v19  ;;  %3705 = vst [vmem:[#allocation8_spill] sm:$0xff] %v2064_v20  ;;  %v2069_v21 = vld [vmem:[%s1986_s24 + $0xa8] sm:$0xff]  ;;  %v2072_v22 = vld [vmem:[%s1986_s24 + $0xa0] sm:$0xff]  ;;  %v194_v50 = vmul.f32 0.5, %v2056_v18  ;;  %v197_v51 = vmul.f32 0.5, %v2061_v19 }
  0x24   : > { %3706 = vst [vmem:[#allocation9_spill] sm:$0xff] %v2069_v21  ;;  %3707 = vst [vmem:[#allocation10_spill] sm:$0xff] %v2072_v22  ;;  %v2077_v23 = vld [vmem:[%s1986_s24 + $0xb8] sm:$0xff]  ;;  %v2080_v24 = vld [vmem:[%s1986_s24 + $0xb0] sm:$0xff]  ;;  %v196_v52 = vmul.f32 0.5, %v2064_v20  ;;  %v199_v53 = vmul.f32 0.5, %v2069_v21 }
  0x25   : > { %237 = vperm.xlu1 %1798, %v2005_v5   ;;  %232 = vperm.xlu0 %1797, %v2008_v6   ;;  %3708 = vst [vmem:[#allocation11_spill] sm:$0xff] %v2077_v23  ;;  %3709 = vst [vmem:[#allocation12_spill] sm:$0xff] %v2080_v24  ;;  %v2085_v25 = vld [vmem:[%s1986_s24 + $0xc8] sm:$0xff]  ;;  %v2088_v26 = vld [vmem:[%s1986_s24 + $0xc0] sm:$0xff]  ;;  %v198_v54 = vmul.f32 0.5, %v2072_v22  ;;  %v201_v55 = vmul.f32 0.5, %v2077_v23 }
  0x26   : > { %3710 = vst [vmem:[#allocation13_spill] sm:$0xff] %v2088_v26  ;;  %v2093_v27 = vld [vmem:[%s1986_s24 + $0xd8] sm:$0xff]  ;;  %v2096_v28 = vld [vmem:[%s1986_s24 + $0xd0] sm:$0xff]  ;;  %v2101_v29 = vld [vmem:[%s1986_s24 + $0xe8] sm:$0xff]  ;;  %v200_v56 = vmul.f32 0.5, %v2080_v24  ;;  %v203_v57 = vmul.f32 0.5, %v2085_v25 }
  0x27   : > { %3711 = vst [vmem:[#allocation14_spill] sm:$0xff] %v2096_v28  ;;  %v2104_v30 = vld [vmem:[%s1986_s24 + $0xe0] sm:$0xff]  ;;  %v2109_v31 = vld [vmem:[%s1986_s24 + $0xf8] sm:$0xff]  ;;  %v2112_v32 = vld [vmem:[%s1986_s24 + $0xf0] sm:$0xff]  ;;  %v202_v58 = vmul.f32 0.5, %v2088_v26  ;;  %v205_v59 = vmul.f32 0.5, %v2093_v27 }
  0x28   : > { %v204_v60 = vmul.f32 0.5, %v2096_v28  ;;  %v207_v61 = vmul.f32 0.5, %v2101_v29  ;;  %v206_v62 = vmul.f32 0.5, %v2104_v30  ;;  %v209_v63 = vmul.f32 0.5, %v2109_v31  ;;  %s1631_s13 = scalar_lea.sflag [#allocation3], %s132_s28  ;;  %s1831_s15 = scalar_lea.vmem %s3531_s2, 256 }
  0x29   : > { %247 = vperm.xlu1 %1798, %v2013_v7   ;;  %242 = vperm.xlu0 %1797, %v2016_v8   ;;  %v208_v0 = vmul.f32 0.5, %v2112_v32  ;;  %p1832_p12 = scmp.ne.s32.totalorder %s3531_s2, %s1831_s15  ;;  %s1915_s17 = smov [#allocation2]  }
  0x2a   : > { %s1835_s9 = sshll.u32 %s1915_s17, 4  ;;  %s1836_s9 = int_to_ptr.vmem [resolvable:$false] %s1835_s9 }
  0x2b   : > { %p1833_p13 = pnand %p1832_p12, %p1966_p4  ;;  %s1837_s20 = scalar_lea.vmem %s1836_s9, 512 }
  0x2c   : > { %p1838_p1 = scmp.lt.s32.totalorder %s3531_s2, %s1836_s9  ;;  %p1839_p2 = scmp.lt.s32.totalorder %s1837_s20, %s1831_s15 }
  0x2d   : > { %257 = vperm.xlu1 %1798, %v2021_v9   ;;  %252 = vperm.xlu0 %1797, %v2024_v10   ;;  %p1834_p0 = pneg %p1833_p13 }
  0x2e   : > { %p1840_p3 = por %p1839_p2, %p1838_p1 }
  0x30   : > { %p1841_p5 = pnand %p1840_p3, %p1834_p0 }
  0x31   : > { %267 = vperm.xlu1 %1798, %v2029_v11   ;;  %262 = vperm.xlu0 %1797, %v2032_v12  }
  0x35   : > { %277 = vperm.xlu1 %1798, %v2037_v13   ;;  %272 = vperm.xlu0 %1797, %v2040_v14  }
  0x39   : > { %287 = vperm.xlu1 %1798, %v2045_v15   ;;  %282 = vperm.xlu0 %1797, %v2048_v16  }
  0x3d   : > { %297 = vperm.xlu1 %1798, %v2053_v17   ;;  %292 = vperm.xlu0 %1797, %v2056_v18  }
  0x41   : > { %307 = vperm.xlu1 %1798, %v2061_v19   ;;  %302 = vperm.xlu0 %1797, %v2064_v20  }
  0x45   : > { %317 = vperm.xlu1 %1798, %v2069_v21   ;;  %312 = vperm.xlu0 %1797, %v2072_v22  }
  0x49   : > { %327 = vperm.xlu1 %1798, %v2077_v23   ;;  %322 = vperm.xlu0 %1797, %v2080_v24  }
  0x4d   : > { %337 = vperm.xlu1 %1798, %v2085_v25   ;;  %332 = vperm.xlu0 %1797, %v2088_v26  }
  0x51   : > { %347 = vperm.xlu1 %1798, %v2093_v27   ;;  %342 = vperm.xlu0 %1797, %v2096_v28  }
  0x55   : > { %357 = vperm.xlu1 %1798, %v2101_v29   ;;  %352 = vperm.xlu0 %1797, %v2104_v30  }
  0x59   : > { %367 = vperm.xlu1 %1798, %v2109_v31   ;;  %362 = vperm.xlu0 %1797, %v2112_v32  }
  0x5d   : > { %436 = vrot.lane.b32.xlu1 %v179_v33, %s1912_s25  ;;  %434 = vrot.lane.b32.xlu0 %v178_v34, %s1912_s25 }
  0x61   : > { %440 = vrot.lane.b32.xlu1 %v181_v35, %s1912_s25  ;;  %438 = vrot.lane.b32.xlu0 %v180_v36, %s1912_s25 }
  0x65   : > { %444 = vrot.lane.b32.xlu1 %v183_v37, %s1912_s25  ;;  %442 = vrot.lane.b32.xlu0 %v182_v38, %s1912_s25 }
  0x69   : > { %448 = vrot.lane.b32.xlu1 %v185_v39, %s1912_s25  ;;  %446 = vrot.lane.b32.xlu0 %v184_v40, %s1912_s25 }
  0x6d   : > { %452 = vrot.lane.b32.xlu1 %v187_v41, %s1912_s25  ;;  %450 = vrot.lane.b32.xlu0 %v186_v42, %s1912_s25 }
  0x71   : > { %456 = vrot.lane.b32.xlu1 %v189_v43, %s1912_s25  ;;  %454 = vrot.lane.b32.xlu0 %v188_v44, %s1912_s25 }
  0x75   : > { %460 = vrot.lane.b32.xlu1 %v191_v45, %s1912_s25  ;;  %458 = vrot.lane.b32.xlu0 %v190_v46, %s1912_s25 }
  0x79   : > { %464 = vrot.lane.b32.xlu1 %v193_v47, %s1912_s25  ;;  %462 = vrot.lane.b32.xlu0 %v192_v48, %s1912_s25 }
  0x7d   : > { %468 = vrot.lane.b32.xlu1 %v195_v49, %s1912_s25  ;;  %466 = vrot.lane.b32.xlu0 %v194_v50, %s1912_s25 }
  0x81   : > { %472 = vrot.lane.b32.xlu1 %v197_v51, %s1912_s25  ;;  %470 = vrot.lane.b32.xlu0 %v196_v52, %s1912_s25 }
  0x85   : > { %476 = vrot.lane.b32.xlu1 %v199_v53, %s1912_s25  ;;  %474 = vrot.lane.b32.xlu0 %v198_v54, %s1912_s25 }
  0x89   : > { %480 = vrot.lane.b32.xlu1 %v201_v55, %s1912_s25  ;;  %478 = vrot.lane.b32.xlu0 %v200_v56, %s1912_s25 }
  0x8d   : > { %484 = vrot.lane.b32.xlu1 %v203_v57, %s1912_s25  ;;  %482 = vrot.lane.b32.xlu0 %v202_v58, %s1912_s25 }
  0x91   : > { %488 = vrot.lane.b32.xlu1 %v205_v59, %s1912_s25  ;;  %486 = vrot.lane.b32.xlu0 %v204_v60, %s1912_s25 }
  0x95   : > { %492 = vrot.lane.b32.xlu1 %v207_v61, %s1912_s25  ;;  %490 = vrot.lane.b32.xlu0 %v206_v62, %s1912_s25 }
  0x99   : > { %496 = vrot.lane.b32.xlu1 %v209_v63, %s1912_s25  ;;  %494 = vrot.lane.b32.xlu0 %v208_v0, %s1912_s25 }
  0x9c   : > { %v223_v33 = vpop.permute.xlu1 %222  ;;  %v213_v34 = vpop.permute.xlu0 %212 }
  0x9d   : > { %v2181_v44 = vmul.f32 %v213_v34, %v1992_v2  ;;  %v2186_v48 = vmul.f32 %v223_v33, %v1989_v1 }
  0x9f   : > { %v595_v47 = vsel %vm594_vm0, %v2181_v44, -inf  ;;  %v601_v2 = vsel %vm594_vm0, %v2186_v48, -inf }
  0xa0   : > { %v228_v35 = vpop.permute.xlu1 %227  ;;  %v218_v36 = vpop.permute.xlu0 %217 }
  0xa1   : > { %v2189_v50 = vmul.f32 %v218_v36, %v2000_v4  ;;  %v2192_v52 = vmul.f32 %v228_v35, %v1997_v3 }
  0xa3   : > { %v598_v1 = vsel %vm594_vm0, %v2189_v50, -inf  ;;  %v604_v3 = vsel %vm594_vm0, %v2192_v52, -inf }
  0xa4   : > { %v238_v37 = vpop.permute.xlu1 %237  ;;  %v233_v38 = vpop.permute.xlu0 %232 }
  0xa5   : > { %v2197_v53 = vmul.f32 %v233_v38, %v2008_v6  ;;  %v2202_v4 = vmul.f32 %v238_v37, %v2005_v5 }
  0xa7   : > { %v607_v6 = vsel %vm594_vm0, %v2197_v53, -inf  ;;  %v610_v5 = vsel %vm594_vm0, %v2202_v4, -inf }
  0xa8   : > { %v248_v39 = vpop.permute.xlu1 %247  ;;  %v243_v40 = vpop.permute.xlu0 %242 }
  0xa9   : > { %v2207_v56 = vmul.f32 %v243_v40, %v2016_v8  ;;  %v2212_v58 = vmul.f32 %v248_v39, %v2013_v7 }
  0xab   : > { %v613_v8 = vsel %vm594_vm0, %v2207_v56, -inf  ;;  %v616_v62 = vsel %vm594_vm0, %v2212_v58, -inf }
  0xac   : > { %v258_v41 = vpop.permute.xlu1 %257  ;;  %v253_v42 = vpop.permute.xlu0 %252 }
  0xad   : > { %v2217_v60 = vmul.f32 %v253_v42, %v2024_v10  ;;  %v2222_v61 = vmul.f32 %v258_v41, %v2021_v9 }
  0xaf   : > { %v619_v10 = vsel %vm594_vm0, %v2217_v60, -inf  ;;  %v622_v9 = vsel %vm594_vm0, %v2222_v61, -inf }
  0xb0   : > { %v268_v43 = vpop.permute.xlu1 %267  ;;  %v263_v45 = vpop.permute.xlu0 %262 }
  0xb1   : > { %v2227_v7 = vmul.f32 %v263_v45, %v2032_v12  ;;  %v2232_v33 = vmul.f32 %v268_v43, %v2029_v11 }
  0xb3   : > { %v625_v12 = vsel %vm594_vm0, %v2227_v7, -inf  ;;  %v628_v11 = vsel %vm594_vm0, %v2232_v33, -inf }
  0xb4   : > { %v278_v46 = vpop.permute.xlu1 %277  ;;  %v273_v49 = vpop.permute.xlu0 %272 }
  0xb5   : > { %v2237_v34 = vmul.f32 %v273_v49, %v2040_v14  ;;  %v2242_v36 = vmul.f32 %v278_v46, %v2037_v13 }
  0xb7   : > { %v631_v14 = vsel %vm594_vm0, %v2237_v34, -inf  ;;  %v634_v40 = vsel %vm594_vm0, %v2242_v36, -inf }
  0xb8   : > { %v288_v51 = vpop.permute.xlu1 %287  ;;  %596 = vmax.xlane.f32.xlu0 %v595_v47  ;;  %v283_v55 = vpop.permute.xlu0 %282 }
  0xb9   : > { %v2247_v38 = vmul.f32 %v283_v55, %v2048_v16  ;;  %v2252_v39 = vmul.f32 %v288_v51, %v2045_v15 }
  0xbb   : > { %v637_v16 = vsel %vm594_vm0, %v2247_v38, -inf  ;;  %v640_v15 = vsel %vm594_vm0, %v2252_v39, -inf }
  0xbc   : > { %v298_v54 = vpop.permute.xlu1 %297  ;;  %602 = vmax.xlane.f32.xlu0 %v601_v2  ;;  %v293_v59 = vpop.permute.xlu0 %292 }
  0xbd   : > { %599 = vmax.xlane.f32.xlu1 %v598_v1  ;;  %v2257_v13 = vmul.f32 %v293_v59, %v2056_v18  ;;  %v2262_v43 = vmul.f32 %v298_v54, %v2053_v17 }
  0xbf   : > { %v643_v46 = vsel %vm594_vm0, %v2257_v13, -inf  ;;  %v646_v2 = vsel %vm594_vm0, %v2262_v43, -inf }
  0xc0   : > { %605 = vmax.xlane.f32.xlu0 %v604_v3  ;;  %v308_v57 = vpop.permute.xlu1 %307  ;;  %v303_v0 = vpop.permute.xlu0 %302 }
  0xc1   : > { %608 = vmax.xlane.f32.xlu1 %v607_v6  ;;  %v2267_v45 = vmul.f32 %v303_v0, %v2064_v20  ;;  %v2272_v49 = vmul.f32 %v308_v57, %v2061_v19 }
  0xc3   : > { %v649_v1 = vsel %vm594_vm0, %v2267_v45, -inf  ;;  %v652_v3 = vsel %vm594_vm0, %v2272_v49, -inf }
  0xc4   : > { %611 = vmax.xlane.f32.xlu0 %v610_v5  ;;  %v318_v63 = vpop.permute.xlu1 %317  ;;  %v313_v37 = vpop.permute.xlu0 %312 }
  0xc5   : > { %614 = vmax.xlane.f32.xlu1 %v613_v8  ;;  %v2277_v54 = vmul.f32 %v313_v37, %v2072_v22  ;;  %v2282_v55 = vmul.f32 %v318_v63, %v2069_v21 }
  0xc7   : > { %v655_v59 = vsel %vm594_vm0, %v2277_v54, -inf }
  0xc8   : > { %617 = vmax.xlane.f32.xlu0 %v616_v62  ;;  %v328_v35 = vpop.permute.xlu1 %327  ;;  %v323_v42 = vpop.permute.xlu0 %322  ;;  %v658_v62 = vsel %vm594_vm0, %v2282_v55, -inf }
  0xc9   : > { %620 = vmax.xlane.f32.xlu1 %v619_v10  ;;  %v2287_v6 = vmul.f32 %v323_v42, %v2080_v24  ;;  %v2292_v8 = vmul.f32 %v328_v35, %v2077_v23 }
  0xcb   : > { %v661_v10 = vsel %vm594_vm0, %v2287_v6, -inf  ;;  %v664_v35 = vsel %vm594_vm0, %v2292_v8, -inf }
  0xcc   : > { %623 = vmax.xlane.f32.xlu0 %v622_v9  ;;  %v338_v41 = vpop.permute.xlu1 %337  ;;  %v333_v51 = vpop.permute.xlu0 %332 }
  0xcd   : > { %626 = vmax.xlane.f32.xlu1 %v625_v12  ;;  %v2297_v63 = vmul.f32 %v333_v51, %v2088_v26  ;;  %v2302_v9 = vmul.f32 %v338_v41, %v2085_v25 }
  0xd0   : > { %629 = vmax.xlane.f32.xlu0 %v628_v11  ;;  %v348_v47 = vpop.permute.xlu1 %347  ;;  %v343_v5 = vpop.permute.xlu0 %342  ;;  %v667_v11 = vsel %vm594_vm0, %v2297_v63, -inf }
  0xd1   : > { %632 = vmax.xlane.f32.xlu1 %v631_v14  ;;  %v2307_v37 = vmul.f32 %v343_v5, %v2096_v28  ;;  %v2312_v14 = vmul.f32 %v348_v47, %v2093_v27 }
  0xd3   : > { %v676_v27 = vsel %vm594_vm0, %v2312_v14, -inf }
  0xd4   : > { %635 = vmax.xlane.f32.xlu0 %v634_v40  ;;  %v358_v57 = vpop.permute.xlu1 %357  ;;  %v353_v12 = vpop.permute.xlu0 %352  ;;  %v670_v40 = vsel %vm594_vm0, %v2302_v9, -inf }
  0xd5   : > { %638 = vmax.xlane.f32.xlu1 %v637_v16  ;;  %v2317_v25 = vmul.f32 %v353_v12, %v2104_v30  ;;  %v673_v16 = vsel %vm594_vm0, %v2307_v37, -inf }
  0xd7   : > { %v679_v30 = vsel %vm594_vm0, %v2317_v25, -inf }
  0xd8   : > { %641 = vmax.xlane.f32.xlu0 %v640_v15  ;;  %v368_v0 = vpop.permute.xlu1 %367  ;;  %v363_v42 = vpop.permute.xlu0 %362  ;;  %v2324_v15 = vmul.f32 %v358_v57, %v2101_v29 }
  0xd9   : > { %644 = vmax.xlane.f32.xlu1 %v643_v46  ;;  %v2329_v46 = vmul.f32 %v363_v42, %v2112_v32  ;;  %v2336_v51 = vmul.f32 %v368_v0, %v2109_v31 }
  0xda   : > { %v682_v29 = vsel %vm594_vm0, %v2324_v15, -inf }
  0xdc   : > { %647 = vmax.xlane.f32.xlu0 %v646_v2  ;;  %v2319_v41 = vpop.permute.xlu1 %436  ;;  %v685_v2 = vsel %vm594_vm0, %v2329_v46, -inf  ;;  %v2342_v32 = vpop.permute.xlu0 %434 }
  0xdd   : > { %650 = vmax.xlane.f32.xlu1 %v649_v1  ;;  %3712 = vst [vmem:[#allocation15_spill] sm:$0xff] %v2319_v41  ;;  %3714 = vst [vmem:[#allocation17_spill] sm:$0xff] %v2342_v32  ;;  %v688_v1 = vsel %vm594_vm0, %v2336_v51, -inf }
  0xe0   : > { %653 = vmax.xlane.f32.xlu0 %v652_v3  ;;  %v2333_v47 = vpop.permute.xlu1 %440  ;;  %v2348_v57 = vpop.permute.xlu0 %438 }
  0xe1   : > { %656 = vmax.xlane.f32.xlu1 %v655_v59  ;;  %3713 = vst [vmem:[#allocation16_spill] sm:$0xff] %v2333_v47  ;;  %3716 = vst [vmem:[#allocation19_spill] sm:$0xff] %v2348_v57  ;;  %v691_v59 = vlaneseq }
  0xe4   : > { %659 = vmax.xlane.f32.xlu0 %v658_v62  ;;  %v2346_v3 = vpop.permute.xlu1 %444  ;;  %v2352_v5 = vpop.permute.xlu0 %442  ;;  %v692_v62 = vand.u32 127, %v691_v59 }
  0xe5   : > { %662 = vmax.xlane.f32.xlu1 %v661_v10  ;;  %3715 = vst [vmem:[#allocation18_spill] sm:$0xff] %v2346_v3  ;;  %3718 = vst [vmem:[#allocation21_spill] sm:$0xff] %v2352_v5 }
  0xe8   : > { %665 = vmax.xlane.f32.xlu0 %v664_v35  ;;  %v2350_v31 = vpop.permute.xlu1 %448  ;;  %v2356_v0 = vpop.permute.xlu0 %446 }
  0xe9   : > { %668 = vmax.xlane.f32.xlu1 %v667_v11  ;;  %3717 = vst [vmem:[#allocation20_spill] sm:$0xff] %v2350_v31  ;;  %3720 = vst [vmem:[#allocation23_spill] sm:$0xff] %v2356_v0 }
  0xec   : > { %671 = vmax.xlane.f32.xlu0 %v670_v40  ;;  %v2354_v10 = vpop.permute.xlu1 %452  ;;  %v2360_v35 = vpop.permute.xlu0 %450 }
  0xed   : > { %674 = vmax.xlane.f32.xlu1 %v673_v16  ;;  %3719 = vst [vmem:[#allocation22_spill] sm:$0xff] %v2354_v10  ;;  %3722 = vst [vmem:[#allocation25_spill] sm:$0xff] %v2360_v35 }
  0xf0   : > { %677 = vmax.xlane.f32.xlu0 %v676_v27  ;;  %v2358_v12 = vpop.permute.xlu1 %456  ;;  %v2364_v40 = vpop.permute.xlu0 %454 }
  0xf1   : > { %680 = vmax.xlane.f32.xlu1 %v679_v30  ;;  %3721 = vst [vmem:[#allocation24_spill] sm:$0xff] %v2358_v12  ;;  %3724 = vst [vmem:[#allocation27_spill] sm:$0xff] %v2364_v40 }
  0xf4   : > { %683 = vmax.xlane.f32.xlu0 %v682_v29  ;;  %v2362_v11 = vpop.permute.xlu1 %460  ;;  %v2368_v42 = vpop.permute.xlu0 %458 }
  0xf5   : > { %686 = vmax.xlane.f32.xlu1 %v685_v2  ;;  %3723 = vst [vmem:[#allocation26_spill] sm:$0xff] %v2362_v11  ;;  %3726 = vst [vmem:[#allocation29_spill] sm:$0xff] %v2368_v42 }
  0xf8   : > { %689 = vmax.xlane.f32.xlu0 %v688_v1  ;;  %v2366_v16 = vpop.permute.xlu1 %464  ;;  %v2372_v30 = vpop.permute.xlu0 %462 }
  0xf9   : > { %3725 = vst [vmem:[#allocation28_spill] sm:$0xff] %v2366_v16  ;;  %3728 = vst [vmem:[#allocation31_spill] sm:$0xff] %v2372_v30 }
  0xfc   : > { %v2370_v27 = vpop.permute.xlu1 %468  ;;  %v2376_v2 = vpop.permute.xlu0 %466 }
  0xfd   : > { %3727 = vst [vmem:[#allocation30_spill] sm:$0xff] %v2370_v27  ;;  %3730 = vst [vmem:[#allocation33_spill] sm:$0xff] %v2376_v2 }
 0x100   : > { %v2374_v29 = vpop.permute.xlu1 %472  ;;  %v2380_v59 = vpop.permute.xlu0 %470 }
 0x101   : > { %3729 = vst [vmem:[#allocation32_spill] sm:$0xff] %v2374_v29  ;;  %3732 = vst [vmem:[#allocation35_spill] sm:$0xff] %v2380_v59 }
 0x104   : > { %v2378_v1 = vpop.permute.xlu1 %476  ;;  %v2384_v11 = vpop.permute.xlu0 %474 }
 0x105   : > { %3731 = vst [vmem:[#allocation34_spill] sm:$0xff] %v2378_v1  ;;  %3734 = vst [vmem:[#allocation37_spill] sm:$0xff] %v2384_v11 }
 0x106   : > { %725 = vrot.lane.b32.xlu1 %v692_v62, %s1913_s26 }
 0x108   : > { %v2382_v62 = vpop.permute.xlu1 %480  ;;  %v2388_v16 = vpop.permute.xlu0 %478 }
 0x109   : > { %3733 = vst [vmem:[#allocation36_spill] sm:$0xff] %v2382_v62  ;;  %3736 = vst [vmem:[#allocation39_spill] sm:$0xff] %v2388_v16 }
 0x10c   : > { %v2386_v12 = vpop.permute.xlu1 %484  ;;  %v2392_v28 = vpop.permute.xlu0 %482 }
 0x10d   : > { %3735 = vst [vmem:[#allocation38_spill] sm:$0xff] %v2386_v12  ;;  %3738 = vst [vmem:[#allocation41_spill] sm:$0xff] %v2392_v28 }
 0x110   : > { %v2390_v42 = vpop.permute.xlu1 %488  ;;  %v2396_v26 = vpop.permute.xlu0 %486 }
 0x111   : > { %3737 = vst [vmem:[#allocation40_spill] sm:$0xff] %v2390_v42  ;;  %3740 = vst [vmem:[#allocation43_spill] sm:$0xff] %v2396_v26 }
 0x114   : > { %v2394_v30 = vpop.permute.xlu1 %492  ;;  %v2400_v23 = vpop.permute.xlu0 %490 }
 0x115   : > { %3739 = vst [vmem:[#allocation42_spill] sm:$0xff] %v2394_v30  ;;  %3742 = vst [vmem:[#allocation45_spill] sm:$0xff] %v2400_v23 }
 0x118   : > { %v2398_v40 = vpop.permute.xlu1 %496  ;;  %v2406_v24 = vpop.permute.xlu0 %494 }
 0x119   : > { %3741 = vst [vmem:[#allocation44_spill] sm:$0xff] %v2398_v40  ;;  %3745 = vst [vmem:[#allocation48_spill] sm:$0xff] %v2406_v24 }
 0x145   : > { %v2410_v16 = vpop.xlane.xlu0 %596 }
 0x146   : > { %3747 = vst [vmem:[#allocation50_spill] sm:$0xff] %v2410_v16  ;;  %vm693_vm1 = vcmp.ge.f32.partialorder %v2181_v44, %v2410_v16 }
 0x149   : > { %v2414_v28 = vpop.xlane.xlu0 %602 }
 0x14a   : > { %v2402_v10 = vpop.xlane.xlu1 %599  ;;  %3749 = vst [vmem:[#allocation52_spill] sm:$0xff] %v2414_v28  ;;  %vm695_vm2 = vcmp.ge.f32.partialorder %v2186_v48, %v2414_v28 }
 0x14b   : > { %3743 = vst [vmem:[#allocation46_spill] sm:$0xff] %v2402_v10  ;;  %vm694_vm3 = vcmp.ge.f32.partialorder %v2189_v50, %v2402_v10 }
 0x14d   : > { %v2420_v40 = vpop.xlane.xlu0 %605 }
 0x14e   : > { %v2404_v62 = vpop.xlane.xlu1 %608  ;;  %3752 = vst [vmem:[#allocation55_spill] sm:$0xff] %v2420_v40  ;;  %vm696_vm5 = vcmp.ge.f32.partialorder %v2192_v52, %v2420_v40 }
 0x14f   : > { %3744 = vst [vmem:[#allocation47_spill] sm:$0xff] %v2404_v62  ;;  %vm697_vm7 = vcmp.ge.f32.partialorder %v2197_v53, %v2404_v62 }
 0x151   : > { %v2424_v35 = vpop.xlane.xlu0 %611 }
 0x152   : > { %v2408_v12 = vpop.xlane.xlu1 %614  ;;  %3754 = vst [vmem:[#allocation57_spill] sm:$0xff] %v2424_v35  ;;  %vm698_vm9 = vcmp.ge.f32.partialorder %v2202_v4, %v2424_v35 }
 0x153   : > { %3746 = vst [vmem:[#allocation49_spill] sm:$0xff] %v2408_v12  ;;  %vm699_vm11 = vcmp.ge.f32.partialorder %v2207_v56, %v2408_v12 }
 0x155   : > { %v2430_v21 = vpop.xlane.xlu0 %617 }
 0x156   : > { %v2412_v42 = vpop.xlane.xlu1 %620  ;;  %3757 = vst [vmem:[#allocation60_spill] sm:$0xff] %v2430_v21  ;;  %vm700_vm4 = vcmp.ge.f32.partialorder %v2212_v58, %v2430_v21 }
 0x157   : > { %3748 = vst [vmem:[#allocation51_spill] sm:$0xff] %v2412_v42  ;;  %vm701_vm6 = vcmp.ge.f32.partialorder %v2217_v60, %v2412_v42 }
 0x159   : > { %v2434_v29 = vpop.xlane.xlu0 %623 }
 0x15a   : > { %v2416_v30 = vpop.xlane.xlu1 %626  ;;  %3759 = vst [vmem:[#allocation62_spill] sm:$0xff] %v2434_v29  ;;  %vm702_vm8 = vcmp.ge.f32.partialorder %v2222_v61, %v2434_v29 }
 0x15b   : > { %3750 = vst [vmem:[#allocation53_spill] sm:$0xff] %v2416_v30  ;;  %vm703_vm10 = vcmp.ge.f32.partialorder %v2227_v7, %v2416_v30 }
 0x15d   : > { %v2440_v27 = vpop.xlane.xlu0 %629 }
 0x15e   : > { %v2418_v26 = vpop.xlane.xlu1 %632  ;;  %3762 = vst [vmem:[#allocation65_spill] sm:$0xff] %v2440_v27  ;;  %vm704_vm12 = vcmp.ge.f32.partialorder %v2232_v33, %v2440_v27 }
 0x15f   : > { %3751 = vst [vmem:[#allocation54_spill] sm:$0xff] %v2418_v26  ;;  %vm705_vm13 = vcmp.ge.f32.partialorder %v2237_v34, %v2418_v26 }
 0x161   : > { %v2444_v11 = vpop.xlane.xlu0 %635 }
 0x162   : > { %v2422_v23 = vpop.xlane.xlu1 %638  ;;  %3764 = vst [vmem:[#allocation67_spill] sm:$0xff] %v2444_v11  ;;  %vm706_vm15 = vcmp.ge.f32.partialorder %v2242_v36, %v2444_v11 }
 0x163   : > { %3753 = vst [vmem:[#allocation56_spill] sm:$0xff] %v2422_v23 }
 0x165   : > { %v2450_v59 = vpop.xlane.xlu0 %641 }
 0x166   : > { %v2426_v1 = vpop.xlane.xlu1 %644  ;;  %3767 = vst [vmem:[#allocation70_spill] sm:$0xff] %v2450_v59 }
 0x167   : > { %3755 = vst [vmem:[#allocation58_spill] sm:$0xff] %v2426_v1 }
 0x169   : > { %v2479_v58 = vpop.xlane.xlu0 %647 }
 0x16a   : > { %v2428_v24 = vpop.xlane.xlu1 %650  ;;  %3768 = vst [vmem:[#allocation71_spill] sm:$0xff] %v2479_v58  ;;  %vm710_vm14 = vcmp.ge.f32.partialorder %v2262_v43, %v2479_v58 }
 0x16b   : > { %3756 = vst [vmem:[#allocation59_spill] sm:$0xff] %v2428_v24 }
 0x16d   : > { %v2508_v40 = vpop.xlane.xlu0 %653 }
 0x16e   : > { %v2432_v31 = vpop.xlane.xlu1 %656  ;;  %3770 = vst [vmem:[#allocation73_spill] sm:$0xff] %v2508_v40 }
 0x16f   : > { %3758 = vst [vmem:[#allocation61_spill] sm:$0xff] %v2432_v31 }
 0x172   : > { %v2436_v19 = vpop.xlane.xlu1 %662 }
 0x173   : > { %3760 = vst [vmem:[#allocation63_spill] sm:$0xff] %v2436_v19 }
 0x176   : > { %v2438_v0 = vpop.xlane.xlu1 %668 }
 0x177   : > { %3761 = vst [vmem:[#allocation64_spill] sm:$0xff] %v2438_v0 }
 0x17a   : > { %v2442_v17 = vpop.xlane.xlu1 %674 }
 0x17b   : > { %3763 = vst [vmem:[#allocation66_spill] sm:$0xff] %v2442_v17 }
 0x17e   : > { %v2446_v22 = vpop.xlane.xlu1 %680 }
 0x17f   : > { %3765 = vst [vmem:[#allocation68_spill] sm:$0xff] %v2446_v22 }
 0x182   : > { %v2448_v3 = vpop.xlane.xlu1 %686 }
 0x183   : > { %3766 = vst [vmem:[#allocation69_spill] sm:$0xff] %v2448_v3 }
 0x186   : > { %v2460_v20 = vpop.permute.xlu1 %725 }
 0x187   : > { %v727_v47 = vsel %vm693_vm1, %v2460_v20, 80  ;;  %v729_v2 = vsel %vm695_vm2, %v2460_v20, 80  ;;  %v728_v18 = vsel %vm694_vm3, %v2460_v20, 80  ;;  %v734_v57 = vsel %vm700_vm4, %v2460_v20, 80 }
 0x188   : > { %v2467_v44 = vsel %vm594_vm0, %v727_v47, 2147483647  ;;  %v2470_v48 = vsel %vm594_vm0, %v729_v2, 2147483647  ;;  %v2473_v50 = vsel %vm594_vm0, %v728_v18, 2147483647  ;;  %vm712_vm1 = vcmp.ge.f32.partialorder %v2272_v49, %v2508_v40 }
 0x189   : > { %v761_v21 = vshra.s32 %v2467_v44, 16  ;;  %v791_v28 = vshra.s32 %v2470_v48, 16  ;;  %v2484_v47 = vsel %vm594_vm0, %v734_v57, 2147483647  ;;  %v730_v2 = vsel %vm696_vm5, %v2460_v20, 80 }
 0x18a   : > { %v735_v18 = vsel %vm701_vm6, %v2460_v20, 80  ;;  %v776_v52 = vshra.s32 %v2473_v50, 16  ;;  %v866_v60 = vshra.s32 %v2484_v47, 16  ;;  %v2497_v42 = vsel %vm594_vm0, %v730_v2, 2147483647 }
 0x18b   : > { %v2488_v10 = vcvt.s32.f32 %v761_v21  ;;  %v2490_v16 = vcvt.s32.f32 %v791_v28  ;;  %v2500_v57 = vsel %vm594_vm0, %v735_v18, 2147483647  ;;  %v731_v21 = vsel %vm697_vm7, %v2460_v20, 80 }
 0x18c   : > { %3769 = vst [vmem:[#allocation72_spill] sm:$0xff] %v2500_v57  ;;  %v736_v28 = vsel %vm702_vm8, %v2460_v20, 80  ;;  %v2510_v53 = vcvt.s32.f32 %v776_v52  ;;  %v2512_v2 = vcvt.s32.f32 %v866_v60  ;;  %v806_v18 = vshra.s32 %v2497_v42, 16 }
 0x18d   : > { %764 = vmin.xlane.f32.xlu0 %v2488_v10  ;;  %794 = vmin.xlane.f32.xlu1 %v2490_v16  ;;  %v881_v62 = vshra.s32 %v2500_v57, 16  ;;  %v2521_v61 = vsel %vm594_vm0, %v731_v21, 2147483647  ;;  %v2524_v29 = vsel %vm594_vm0, %v736_v28, 2147483647  ;;  %v732_v52 = vsel %vm698_vm9, %v2460_v20, 80 }
 0x18e   : > { %v737_v60 = vsel %vm703_vm10, %v2460_v20, 80  ;;  %v2530_v57 = vcvt.s32.f32 %v806_v18  ;;  %v821_v7 = vshra.s32 %v2521_v61, 16  ;;  %v896_v21 = vshra.s32 %v2524_v29, 16  ;;  %v2546_v18 = vpop.xlane.xlu0 %659 }
 0x18f   : > { %v2532_v4 = vcvt.s32.f32 %v881_v62  ;;  %v2541_v28 = vsel %vm594_vm0, %v732_v52, 2147483647  ;;  %v2544_v30 = vsel %vm594_vm0, %v737_v60, 2147483647  ;;  %3772 = vst [vmem:[#allocation75_spill] sm:$0xff] %v2546_v18  ;;  %v733_v62 = vsel %vm699_vm11, %v2460_v20, 80 }
 0x190   : > { %3771 = vst [vmem:[#allocation74_spill] sm:$0xff] %v2544_v30  ;;  %v738_v35 = vsel %vm704_vm12, %v2460_v20, 80  ;;  %v2552_v56 = vcvt.s32.f32 %v821_v7  ;;  %v2554_v12 = vcvt.s32.f32 %v896_v21  ;;  %v836_v33 = vshra.s32 %v2541_v28, 16 }
 0x191   : > { %779 = vmin.xlane.f32.xlu0 %v2510_v53  ;;  %869 = vmin.xlane.f32.xlu1 %v2512_v2  ;;  %v911_v52 = vshra.s32 %v2544_v30, 16  ;;  %v2563_v60 = vsel %vm594_vm0, %v733_v62, 2147483647  ;;  %v2566_v27 = vsel %vm594_vm0, %v738_v35, 2147483647  ;;  %v739_v7 = vsel %vm705_vm13, %v2460_v20, 80 }
 0x192   : > { %3773 = vst [vmem:[#allocation76_spill] sm:$0xff] %v2566_v27  ;;  %v744_v21 = vsel %vm710_vm14, %v2460_v20, 80  ;;  %v2572_v30 = vpop.xlane.xlu0 %665  ;;  %v2574_v34 = vcvt.s32.f32 %v836_v33  ;;  %v851_v43 = vshra.s32 %v2563_v60, 16  ;;  %v926_v62 = vshra.s32 %v2566_v27, 16 }
 0x193   : > { %3774 = vst [vmem:[#allocation77_spill] sm:$0xff] %v2572_v30  ;;  %v2576_v26 = vcvt.s32.f32 %v911_v52  ;;  %v2585_v35 = vsel %vm594_vm0, %v739_v7, 2147483647  ;;  %v2588_v58 = vsel %vm594_vm0, %v744_v21, 2147483647  ;;  %v740_v33 = vsel %vm706_vm15, %v2460_v20, 80 }
 0x194   : > { %v746_v52 = vsel %vm712_vm1, %v2460_v20, 80  ;;  %v2594_v27 = vcvt.s32.f32 %v851_v43  ;;  %v2596_v36 = vcvt.s32.f32 %v926_v62  ;;  %v941_v49 = vshra.s32 %v2585_v35, 16 }
 0x195   : > { %809 = vmin.xlane.f32.xlu0 %v2530_v57  ;;  %884 = vmin.xlane.f32.xlu1 %v2532_v4  ;;  %v1016_v7 = vshra.s32 %v2588_v58, 16  ;;  %vm709_vm2 = vcmp.ge.f32.partialorder %v2257_v13, %v2426_v1  ;;  %vm714_vm3 = vcmp.ge.f32.partialorder %v2282_v55, %v2546_v18  ;;  %v2605_v21 = vsel %vm594_vm0, %v740_v33, 2147483647 }
 0x196   : > { %v2608_v11 = vsel %vm594_vm0, %v746_v52, 2147483647  ;;  %v2610_v43 = vpop.xlane.xlu0 %671  ;;  %v743_v62 = vsel %vm709_vm2, %v2460_v20, 80  ;;  %v748_v40 = vsel %vm714_vm3, %v2460_v20, 80  ;;  %v2616_v13 = vcvt.s32.f32 %v941_v49 }
 0x197   : > { %3775 = vst [vmem:[#allocation78_spill] sm:$0xff] %v2608_v11  ;;  %3776 = vst [vmem:[#allocation79_spill] sm:$0xff] %v2610_v43  ;;  %v2618_v1 = vcvt.s32.f32 %v1016_v7  ;;  %v956_v55 = vshra.s32 %v2605_v21, 16  ;;  %v1046_v33 = vshra.s32 %v2608_v11, 16  ;;  %vm711_vm4 = vcmp.ge.f32.partialorder %v2267_v45, %v2428_v24 }
 0x198   : > { %vm716_vm5 = vcmp.ge.f32.partialorder %v2292_v8, %v2572_v30  ;;  %v2627_v52 = vsel %vm594_vm0, %v743_v62, 2147483647  ;;  %v2630_v18 = vsel %vm594_vm0, %v748_v40, 2147483647  ;;  %v745_v49 = vsel %vm711_vm4, %v2460_v20, 80 }
 0x199   : > { %824 = vmin.xlane.f32.xlu0 %v2552_v56  ;;  %899 = vmin.xlane.f32.xlu1 %v2554_v12  ;;  %3777 = vst [vmem:[#allocation80_spill] sm:$0xff] %v2630_v18  ;;  %v750_v7 = vsel %vm716_vm5, %v2460_v20, 80  ;;  %v2638_v45 = vcvt.s32.f32 %v956_v55  ;;  %v2640_v24 = vcvt.s32.f32 %v1046_v33  ;;  %v1001_v8 = vshra.s32 %v2627_v52, 16 }
 0x19a   : > { %v2636_v11 = vpop.xlane.xlu0 %677  ;;  %v1076_v62 = vshra.s32 %v2630_v18, 16  ;;  %vm713_vm6 = vcmp.ge.f32.partialorder %v2277_v54, %v2432_v31  ;;  %vm718_vm7 = vcmp.ge.f32.partialorder %v2302_v9, %v2610_v43  ;;  %v2649_v40 = vsel %vm594_vm0, %v745_v49, 2147483647 }
 0x19b   : > { %3778 = vst [vmem:[#allocation81_spill] sm:$0xff] %v2636_v11  ;;  %v2652_v30 = vsel %vm594_vm0, %v750_v7, 2147483647  ;;  %v747_v55 = vsel %vm713_vm6, %v2460_v20, 80  ;;  %v752_v33 = vsel %vm718_vm7, %v2460_v20, 80  ;;  %v2658_v18 = vcvt.s32.f32 %v1001_v8 }
 0x19c   : > { %v2660_v54 = vcvt.s32.f32 %v1076_v62  ;;  %v1031_v9 = vshra.s32 %v2649_v40, 16  ;;  %v1106_v49 = vshra.s32 %v2652_v30, 16  ;;  %vm715_vm8 = vcmp.ge.f32.partialorder %v2287_v6, %v2436_v19 }
 0x19d   : > { %839 = vmin.xlane.f32.xlu0 %v2574_v34  ;;  %914 = vmin.xlane.f32.xlu1 %v2576_v26  ;;  %vm720_vm9 = vcmp.ge.f32.partialorder %v2312_v14, %v2636_v11  ;;  %v2669_v7 = vsel %vm594_vm0, %v747_v55, 2147483647  ;;  %v2672_v43 = vsel %vm594_vm0, %v752_v33, 2147483647  ;;  %v749_v62 = vsel %vm715_vm8, %v2460_v20, 80 }
 0x19e   : > { %3779 = vst [vmem:[#allocation82_spill] sm:$0xff] %v2672_v43  ;;  %v2674_v8 = vpop.xlane.xlu0 %683  ;;  %v754_v31 = vsel %vm720_vm9, %v2460_v20, 80  ;;  %v2680_v6 = vcvt.s32.f32 %v1031_v9  ;;  %v2682_v19 = vcvt.s32.f32 %v1106_v49  ;;  %v1061_v14 = vshra.s32 %v2669_v7, 16 }
 0x19f   : > { %3780 = vst [vmem:[#allocation83_spill] sm:$0xff] %v2674_v8  ;;  %v1136_v55 = vshra.s32 %v2672_v43, 16  ;;  %vm717_vm10 = vcmp.ge.f32.partialorder %v2297_v63, %v2438_v0  ;;  %vm722_vm11 = vcmp.ge.f32.partialorder %v2324_v15, %v2674_v8  ;;  %v2691_v33 = vsel %vm594_vm0, %v749_v62, 2147483647 }
 0x1a0   : > { %v2694_v11 = vsel %vm594_vm0, %v754_v31, 2147483647  ;;  %v751_v9 = vsel %vm717_vm10, %v2460_v20, 80  ;;  %v756_v49 = vsel %vm722_vm11, %v2460_v20, 80  ;;  %v2702_v63 = vcvt.s32.f32 %v1061_v14 }
 0x1a1   : > { %854 = vmin.xlane.f32.xlu0 %v2594_v27  ;;  %929 = vmin.xlane.f32.xlu1 %v2596_v36  ;;  %v2704_v0 = vcvt.s32.f32 %v1136_v55  ;;  %v1091_v15 = vshra.s32 %v2691_v33, 16  ;;  %v1166_v62 = vshra.s32 %v2694_v11, 16  ;;  %vm719_vm12 = vcmp.ge.f32.partialorder %v2307_v37, %v2442_v17 }
 0x1a2   : > { %v2700_v43 = vpop.xlane.xlu0 %689  ;;  %vm723_vm13 = vcmp.ge.f32.partialorder %v2329_v46, %v2448_v3  ;;  %v2713_v31 = vsel %vm594_vm0, %v751_v9, 2147483647  ;;  %v2716_v8 = vsel %vm594_vm0, %v756_v49, 2147483647  ;;  %v753_v14 = vsel %vm719_vm12, %v2460_v20, 80 }
 0x1a3   : > { %3781 = vst [vmem:[#allocation84_spill] sm:$0xff] %v2700_v43  ;;  %3782 = vst [vmem:[#allocation85_spill] sm:$0xff] %v2716_v8  ;;  %v757_v55 = vsel %vm723_vm13, %v2460_v20, 80  ;;  %vm724_vm14 = vcmp.ge.f32.partialorder %v2336_v51, %v2700_v43  ;;  %v2724_v37 = vcvt.s32.f32 %v1091_v15  ;;  %v2726_v46 = vcvt.s32.f32 %v1166_v62 }
 0x1a4   : > { %v1121_v9 = vshra.s32 %v2713_v31, 16  ;;  %v1196_v49 = vshra.s32 %v2716_v8, 16  ;;  %vm721_vm15 = vcmp.ge.f32.partialorder %v2317_v25, %v2446_v22  ;;  %v2733_v3 = vsel %vm594_vm0, %v753_v14, 2147483647 }
 0x1a5   : > { %944 = vmin.xlane.f32.xlu1 %v2616_v13  ;;  %1019 = vmin.xlane.f32.xlu0 %v2618_v1  ;;  %v2736_v17 = vsel %vm594_vm0, %v757_v55, 2147483647  ;;  %v755_v51 = vsel %vm721_vm15, %v2460_v20, 80  ;;  %v758_v15 = vsel %vm724_vm14, %v2460_v20, 80  ;;  %v1151_v25 = vshra.s32 %v2733_v3, 16 }
 0x1a6   : > { %3783 = vst [vmem:[#allocation86_spill] sm:$0xff] %v2736_v17  ;;  %v2742_v62 = vcvt.s32.f32 %v1121_v9  ;;  %v2744_v43 = vcvt.s32.f32 %v1196_v49  ;;  %v1211_v14 = vshra.s32 %v2736_v17, 16  ;;  %vm707_vm1 = vcmp.ge.f32.partialorder %v2247_v38, %v2422_v23 }
 0x1a7   : > { %v2751_v55 = vsel %vm594_vm0, %v755_v51, 2147483647  ;;  %v2754_v22 = vsel %vm594_vm0, %v758_v15, 2147483647  ;;  %v741_v9 = vsel %vm707_vm1, %v2460_v20, 80  ;;  %v2759_v49 = vcvt.s32.f32 %v1151_v25 }
 0x1a8   : > { %3784 = vst [vmem:[#allocation87_spill] sm:$0xff] %v2744_v43  ;;  %3785 = vst [vmem:[#allocation88_spill] sm:$0xff] %v2754_v22  ;;  %v2761_v8 = vcvt.s32.f32 %v1211_v14  ;;  %v1181_v17 = vshra.s32 %v2751_v55, 16  ;;  %v1226_v38 = vshra.s32 %v2754_v22, 16  ;;  %vm708_vm2 = vcmp.ge.f32.partialorder %v2252_v39, %v2450_v59  ;;  %v2797_v59 = vld [vmem:[%s1986_s24] sm:$0xff]  ;;  %v2809_v22 = vld [vmem:[%s1986_s24 + $0x10] sm:$0xff] }
 0x1a9   : > { %959 = vmin.xlane.f32.xlu1 %v2638_v45  ;;  %1049 = vmin.xlane.f32.xlu0 %v2640_v24  ;;  %v2768_v51 = vsel %vm594_vm0, %v741_v9, 2147483647  ;;  %v742_v15 = vsel %vm708_vm2, %v2460_v20, 80  ;;  %3790 = vst [vmem:[#allocation93_spill] sm:$0xff] %v2797_v59  ;;  %3792 = vst [vmem:[#allocation95_spill] sm:$0xff] %v2809_v22 }
 0x1aa   : > { %3786 = vst [vmem:[#allocation89_spill] sm:$0xff] %v2761_v8  ;;  %v2773_v25 = vcvt.s32.f32 %v1181_v17  ;;  %v2775_v14 = vcvt.s32.f32 %v1226_v38  ;;  %v971_v23 = vshra.s32 %v2768_v51, 16  ;;  %v2779_v39 = vsel %vm594_vm0, %v742_v15, 2147483647  ;;  %v2791_v38 = vld [vmem:[%s1986_s24 + $0x8] sm:$0xff] }
 0x1ab   : > { %v986_v20 = vshra.s32 %v2779_v39, 16  ;;  %3789 = vst [vmem:[#allocation92_spill] sm:$0xff] %v2791_v38  ;;  %v563_v15 = vadd.f32 %v2791_v38, %v2319_v41  ;;  %v3793_v38 = vld [vmem:[#allocation19_spill] sm:$0xff]  ;;  %v3794_v41 = vld [vmem:[#allocation6_spill] sm:$0xff] }
 0x1ac   : > { %3787 = vst [vmem:[#allocation90_spill] sm:$0xff] %v2773_v25  ;;  %3788 = vst [vmem:[#allocation91_spill] sm:$0xff] %v2775_v14  ;;  %v2783_v9 = vcvt.s32.f32 %v971_v23  ;;  %v562_v23 = vadd.f32 %v2797_v59, %v2342_v32  ;;  %v2818_v59 = vld [vmem:[%s1986_s24 + $0x18] sm:$0xff] }
 0x1ad   : > { %1004 = vmin.xlane.f32.xlu1 %v2658_v18  ;;  %1079 = vmin.xlane.f32.xlu0 %v2660_v54  ;;  %v2787_v17 = vcvt.s32.f32 %v986_v20  ;;  %3796 = vst [vmem:[#allocation6_spill] sm:$0xff] %v2818_v59 }
 0x1b1   : > { %1034 = vmin.xlane.f32.xlu1 %v2680_v6  ;;  %1109 = vmin.xlane.f32.xlu0 %v2682_v19 }
 0x1b5   : > { %1064 = vmin.xlane.f32.xlu1 %v2702_v63  ;;  %1139 = vmin.xlane.f32.xlu0 %v2704_v0 }
 0x1b9   : > { %1094 = vmin.xlane.f32.xlu1 %v2724_v37  ;;  %1169 = vmin.xlane.f32.xlu0 %v2726_v46 }
 0x1bd   : > { %1124 = vmin.xlane.f32.xlu1 %v2742_v62  ;;  %1199 = vmin.xlane.f32.xlu0 %v2744_v43 }
 0x1c1   : > { %1154 = vmin.xlane.f32.xlu1 %v2759_v49  ;;  %1214 = vmin.xlane.f32.xlu0 %v2761_v8  ;;  %v3795_v8 = vld [vmem:[#allocation33_spill] sm:$0xff] }
 0x1c2   : > { %v578_v43 = vadd.f32 %v3795_v8, %v3794_v41  ;;  %v3801_v41 = vld [vmem:[#allocation18_spill] sm:$0xff]  ;;  %v3803_v8 = vld [vmem:[#allocation37_spill] sm:$0xff] }
 0x1c5   : > { %1184 = vmin.xlane.f32.xlu1 %v2773_v25  ;;  %1229 = vmin.xlane.f32.xlu0 %v2775_v14  ;;  %v2802_v14 = vld [vmem:[%s1986_s24 + $0x20] sm:$0xff] }
 0x1c6   : > { %3791 = vst [vmem:[#allocation94_spill] sm:$0xff] %v2802_v14  ;;  %v566_v20 = vadd.f32 %v2802_v14, %v2352_v5  ;;  %v3797_v14 = vld [vmem:[#allocation16_spill] sm:$0xff]  ;;  %v3799_v5 = vld [vmem:[#allocation35_spill] sm:$0xff] }
 0x1c9   : > { %974 = vmin.xlane.f32.xlu1 %v2783_v9 }
 0x1cd   : > { %989 = vmin.xlane.f32.xlu1 %v2787_v17 }
 0x1db   : > { %1305 = vrot.lane.b32.xlu0 %v563_v15, %s1914_s27  ;;  %v564_v15 = vadd.f32 %v2809_v22, %v3793_v38  ;;  %v2827_v22 = vld [vmem:[%s1986_s24 + $0x28] sm:$0xff] }
 0x1de   : > { %1303 = vrot.lane.b32.xlu1 %v562_v23, %s1914_s27  ;;  %v565_v23 = vadd.f32 %v2818_v59, %v3797_v14  ;;  %v3804_v59 = vld [vmem:[#allocation5_spill] sm:$0xff]  ;;  %v3805_v14 = vld [vmem:[#allocation30_spill] sm:$0xff] }
 0x1df   : > { %1311 = vrot.lane.b32.xlu0 %v566_v20, %s1914_s27  ;;  %v3798_v20 = vld [vmem:[#allocation8_spill] sm:$0xff] }
 0x1e0   : > { %v580_v32 = vadd.f32 %v3799_v5, %v3798_v20  ;;  %3800 = vst [vmem:[#allocation8_spill] sm:$0xff] %v2827_v22  ;;  %v579_v20 = vadd.f32 %v3805_v14, %v3804_v59  ;;  %v3812_v59 = vld [vmem:[#allocation9_spill] sm:$0xff]  ;;  %v3813_v14 = vld [vmem:[#allocation34_spill] sm:$0xff] }
 0x1e2   : > { %1307 = vrot.lane.b32.xlu1 %v564_v15, %s1914_s27  ;;  %v567_v15 = vadd.f32 %v2827_v22, %v3801_v41  ;;  %v3808_v22 = vld [vmem:[#allocation7_spill] sm:$0xff]  ;;  %v3809_v41 = vld [vmem:[#allocation32_spill] sm:$0xff] }
 0x1e3   : > { %1335 = vrot.lane.b32.xlu0 %v578_v43, %s1914_s27  ;;  %v3802_v43 = vld [vmem:[#allocation10_spill] sm:$0xff] }
 0x1e4   : > { %v582_v38 = vadd.f32 %v3803_v8, %v3802_v43  ;;  %v581_v43 = vadd.f32 %v3809_v41, %v3808_v22  ;;  %v3816_v22 = vld [vmem:[#allocation12_spill] sm:$0xff]  ;;  %v3817_v41 = vld [vmem:[#allocation39_spill] sm:$0xff] }
 0x1e6   : > { %1309 = vrot.lane.b32.xlu1 %v565_v23, %s1914_s27  ;;  %v2838_v23 = vld [vmem:[%s1986_s24 + $0x30] sm:$0xff] }
 0x1e7   : > { %1339 = vrot.lane.b32.xlu0 %v580_v32, %s1914_s27  ;;  %3806 = vst [vmem:[#allocation10_spill] sm:$0xff] %v2838_v23  ;;  %v3807_v32 = vld [vmem:[#allocation23_spill] sm:$0xff] }
 0x1e8   : > { %v568_v5 = vadd.f32 %v2838_v23, %v3807_v32  ;;  %v583_v23 = vadd.f32 %v3813_v14, %v3812_v59  ;;  %v2856_v32 = vld [vmem:[%s1986_s24 + $0x40] sm:$0xff]  ;;  %v3820_v59 = vld [vmem:[#allocation11_spill] sm:$0xff]  ;;  %v3821_v14 = vld [vmem:[#allocation36_spill] sm:$0xff] }
 0x1e9   : > { %3814 = vst [vmem:[#allocation7_spill] sm:$0xff] %v2856_v32  ;;  %v585_v25 = vadd.f32 %v3821_v14, %v3820_v59  ;;  %v3828_v59 = vld [vmem:[#allocation14_spill] sm:$0xff]  ;;  %v3829_v14 = vld [vmem:[#allocation43_spill] sm:$0xff] }
 0x1ea   : > { %1313 = vrot.lane.b32.xlu1 %v567_v15, %s1914_s27  ;;  %v2847_v15 = vld [vmem:[%s1986_s24 + $0x38] sm:$0xff] }
 0x1eb   : > { %1343 = vrot.lane.b32.xlu0 %v582_v38, %s1914_s27  ;;  %3810 = vst [vmem:[#allocation5_spill] sm:$0xff] %v2847_v15  ;;  %v3811_v38 = vld [vmem:[#allocation20_spill] sm:$0xff] }
 0x1ec   : > { %v569_v8 = vadd.f32 %v2847_v15, %v3811_v38  ;;  %v584_v15 = vadd.f32 %v3817_v41, %v3816_v22  ;;  %v2865_v38 = vld [vmem:[%s1986_s24 + $0x48] sm:$0xff]  ;;  %v3824_v22 = vld [vmem:[#allocation13_spill] sm:$0xff] }
 0x1ed   : > { %3818 = vst [vmem:[#allocation9_spill] sm:$0xff] %v2865_v38  ;;  %v3825_v41 = vld [vmem:[#allocation41_spill] sm:$0xff] }
 0x1ee   : > { %1337 = vrot.lane.b32.xlu1 %v579_v20, %s1914_s27  ;;  %v3815_v20 = vld [vmem:[#allocation25_spill] sm:$0xff] }
 0x1ef   : > { %1315 = vrot.lane.b32.xlu0 %v568_v5, %s1914_s27  ;;  %v570_v5 = vadd.f32 %v2856_v32, %v3815_v20  ;;  %v2874_v32 = vld [vmem:[%s1986_s24 + $0x50] sm:$0xff]  ;;  %v586_v20 = vadd.f32 %v3825_v41, %v3824_v22 }
 0x1f0   : > { %3822 = vst [vmem:[#allocation12_spill] sm:$0xff] %v2874_v32 }
 0x1f2   : > { %1341 = vrot.lane.b32.xlu1 %v581_v43, %s1914_s27  ;;  %v3819_v43 = vld [vmem:[#allocation22_spill] sm:$0xff] }
 0x1f3   : > { %1317 = vrot.lane.b32.xlu0 %v569_v8, %s1914_s27  ;;  %v571_v8 = vadd.f32 %v2865_v38, %v3819_v43  ;;  %v588_v43 = vadd.f32 %v3829_v14, %v3828_v59 }
 0x1f6   : > { %1345 = vrot.lane.b32.xlu1 %v583_v23, %s1914_s27  ;;  %v3823_v23 = vld [vmem:[#allocation27_spill] sm:$0xff] }
 0x1f7   : > { %1319 = vrot.lane.b32.xlu0 %v570_v5, %s1914_s27  ;;  %v572_v5 = vadd.f32 %v2874_v32, %v3823_v23 }
 0x1fa   : > { %1347 = vrot.lane.b32.xlu1 %v584_v15, %s1914_s27  ;;  %v2884_v15 = vld [vmem:[%s1986_s24 + $0xc8] sm:$0xff] }
 0x1fb   : > { %1321 = vrot.lane.b32.xlu0 %v571_v8, %s1914_s27  ;;  %3826 = vst [vmem:[#allocation11_spill] sm:$0xff] %v2884_v15  ;;  %v3827_v8 = vld [vmem:[#allocation38_spill] sm:$0xff] }
 0x1fc   : > { %v587_v38 = vadd.f32 %v2884_v15, %v3827_v8 }
 0x1fe   : > { %1349 = vrot.lane.b32.xlu1 %v585_v25, %s1914_s27  ;;  %v760_v25 = vand.u32 65535, %v2467_v44 }
 0x1ff   : > { %1323 = vrot.lane.b32.xlu0 %v572_v5, %s1914_s27 }
 0x200   : > { %v762_v22 = vcvt.s32.f32 %v760_v25 }
 0x202   : > { %1351 = vrot.lane.b32.xlu1 %v586_v20, %s1914_s27  ;;  %v775_v20 = vand.u32 65535, %v2473_v50 }
 0x204   : > { %v777_v59 = vcvt.s32.f32 %v775_v20 }
 0x206   : > { %1353 = vrot.lane.b32.xlu1 %v587_v38, %s1914_s27 }
 0x20a   : > { %1355 = vrot.lane.b32.xlu1 %v588_v43, %s1914_s27  ;;  %v790_v43 = vand.u32 65535, %v2470_v48 }
 0x20c   : > { %v792_v25 = vcvt.s32.f32 %v790_v43  ;;  %v835_v43 = vand.u32 65535, %v2541_v28 }
 0x21a   : > { %v2893_v5 = vpop.xlane.xlu1 %794  ;;  %v2895_v32 = vpop.xlane.xlu0 %764 }
 0x21b   : > { %vm766_vm0 = vcmp.eq.f32.partialorder %v2488_v10, %v2895_v32  ;;  %vm796_vm4 = vcmp.eq.f32.partialorder %v2490_v16, %v2893_v5  ;;  %v820_v16 = vand.u32 65535, %v2521_v61  ;;  %v837_v61 = vcvt.s32.f32 %v835_v43  ;;  %v3833_v43 = vld [vmem:[#allocation72_spill] sm:$0xff] }
 0x21c   : > { %v767_v41 = vsel %vm766_vm0, %v762_v22, inf  ;;  %v797_v22 = vsel %vm796_vm4, %v792_v25, inf }
 0x21e   : > { %v2900_v15 = vpop.xlane.xlu1 %869  ;;  %768 = vmin.xlane.f32.xlu0 %v767_v41  ;;  %v2902_v38 = vpop.xlane.xlu0 %779  ;;  %v805_v41 = vand.u32 65535, %v2497_v42  ;;  %v822_v42 = vcvt.s32.f32 %v820_v16  ;;  %v865_v16 = vand.u32 65535, %v2484_v47 }
 0x21f   : > { %vm781_vm3 = vcmp.eq.f32.partialorder %v2510_v53, %v2902_v38  ;;  %vm871_vm9 = vcmp.eq.f32.partialorder %v2512_v2, %v2900_v15 }
 0x220   : > { %v782_v44 = vsel %vm781_vm3, %v777_v59, inf  ;;  %v807_v53 = vcvt.s32.f32 %v805_v41  ;;  %v850_v41 = vand.u32 65535, %v2563_v60  ;;  %v880_v60 = vand.u32 65535, %v3833_v43 }
 0x222   : > { %v2909_v50 = vpop.xlane.xlu1 %884  ;;  %783 = vmin.xlane.f32.xlu0 %v782_v44  ;;  %v2911_v10 = vpop.xlane.xlu0 %809  ;;  %v852_v28 = vcvt.s32.f32 %v850_v41  ;;  %v882_v47 = vcvt.s32.f32 %v880_v60  ;;  %v895_v41 = vand.u32 65535, %v2524_v29  ;;  %v3835_v60 = vld [vmem:[#allocation76_spill] sm:$0xff] }
 0x223   : > { %vm811_vm5 = vcmp.eq.f32.partialorder %v2530_v57, %v2911_v10  ;;  %vm886_vm10 = vcmp.eq.f32.partialorder %v2532_v4, %v2909_v50 }
 0x224   : > { %v812_v20 = vsel %vm811_vm5, %v807_v53, inf }
 0x226   : > { %v2914_v14 = vpop.xlane.xlu1 %899  ;;  %798 = vmin.xlane.f32.xlu0 %v797_v22  ;;  %v2916_v48 = vpop.xlane.xlu0 %824 }
 0x227   : > { %vm826_vm6 = vcmp.eq.f32.partialorder %v2552_v56, %v2916_v48  ;;  %vm901_vm11 = vcmp.eq.f32.partialorder %v2554_v12, %v2914_v14 }
 0x228   : > { %v827_v25 = vsel %vm826_vm6, %v822_v42, inf  ;;  %v867_v42 = vcvt.s32.f32 %v865_v16  ;;  %v3834_v16 = vld [vmem:[#allocation74_spill] sm:$0xff] }
 0x22a   : > { %v2921_v59 = vpop.xlane.xlu1 %914  ;;  %813 = vmin.xlane.f32.xlu0 %v812_v20  ;;  %v2923_v44 = vpop.xlane.xlu0 %839 }
 0x22b   : > { %vm841_vm7 = vcmp.eq.f32.partialorder %v2574_v34, %v2923_v44  ;;  %vm916_vm12 = vcmp.eq.f32.partialorder %v2576_v26, %v2921_v59 }
 0x22c   : > { %v842_v53 = vsel %vm841_vm7, %v837_v61, inf }
 0x22e   : > { %v2928_v22 = vpop.xlane.xlu1 %929  ;;  %828 = vmin.xlane.f32.xlu0 %v827_v25  ;;  %v2932_v57 = vpop.xlane.xlu0 %854  ;;  %v872_v25 = vsel %vm871_vm9, %v867_v42, inf }
 0x22f   : > { %3830 = vst [vmem:[#allocation27_spill] sm:$0xff] %v2928_v22  ;;  %vm856_vm8 = vcmp.eq.f32.partialorder %v2594_v27, %v2932_v57  ;;  %vm931_vm13 = vcmp.eq.f32.partialorder %v2596_v36, %v2928_v22 }
 0x230   : > { %v857_v20 = vsel %vm856_vm8, %v852_v28, inf  ;;  %v897_v28 = vcvt.s32.f32 %v895_v41 }
 0x232   : > { %v2937_v56 = vpop.xlane.xlu1 %944  ;;  %843 = vmin.xlane.f32.xlu0 %v842_v53  ;;  %v2949_v61 = vpop.xlane.xlu0 %1019  ;;  %v887_v53 = vsel %vm886_vm10, %v882_v47, inf  ;;  %v902_v4 = vsel %vm901_vm11, %v897_v28, inf  ;;  %v940_v28 = vand.u32 65535, %v2585_v35 }
 0x233   : > { %3831 = vst [vmem:[#allocation13_spill] sm:$0xff] %v2937_v56  ;;  %vm946_vm14 = vcmp.eq.f32.partialorder %v2616_v13, %v2937_v56  ;;  %v970_v13 = vand.u32 65535, %v2768_v51  ;;  %vm1021_vm3 = vcmp.eq.f32.partialorder %v2618_v1, %v2949_v61  ;;  %v3870_v56 = vld [vmem:[#allocation93_spill] sm:$0xff] }
 0x236   : > { %v2942_v34 = vpop.xlane.xlu1 %959  ;;  %858 = vmin.xlane.f32.xlu0 %v857_v20  ;;  %v910_v20 = vand.u32 65535, %v3834_v16  ;;  %v2957_v42 = vpop.xlane.xlu0 %1049 }
 0x237   : > { %3832 = vst [vmem:[#allocation38_spill] sm:$0xff] %v2942_v34  ;;  %vm961_vm15 = vcmp.eq.f32.partialorder %v2638_v45, %v2942_v34  ;;  %vm1051_vm5 = vcmp.eq.f32.partialorder %v2640_v24, %v2957_v42  ;;  %v3869_v34 = vld [vmem:[#allocation17_spill] sm:$0xff] }
 0x238   : > { %v912_v29 = vcvt.s32.f32 %v910_v20  ;;  %v942_v20 = vcvt.s32.f32 %v940_v28 }
 0x23a   : > { %v2947_v27 = vpop.xlane.xlu1 %1004  ;;  %873 = vmin.xlane.f32.xlu0 %v872_v25  ;;  %v925_v25 = vand.u32 65535, %v3835_v60  ;;  %v917_v47 = vsel %vm916_vm12, %v912_v29, inf  ;;  %v2968_v41 = vpop.xlane.xlu0 %1079  ;;  %v947_v36 = vsel %vm946_vm14, %v942_v20, inf  ;;  %v985_v20 = vand.u32 65535, %v2779_v39 }
 0x23b   : > { %vm1006_vm2 = vcmp.eq.f32.partialorder %v2658_v18, %v2947_v27  ;;  %vm1081_vm7 = vcmp.eq.f32.partialorder %v2660_v54, %v2968_v41 }
 0x23e   : > { %v2954_v2 = vpop.xlane.xlu1 %1034  ;;  %888 = vmin.xlane.f32.xlu0 %v887_v53  ;;  %v927_v53 = vcvt.s32.f32 %v925_v25  ;;  %v2976_v29 = vpop.xlane.xlu0 %1109 }
 0x23f   : > { %vm1036_vm4 = vcmp.eq.f32.partialorder %v2680_v6, %v2954_v2  ;;  %vm1111_vm9 = vcmp.eq.f32.partialorder %v2682_v19, %v2976_v29 }
 0x240   : > { %v932_v16 = vsel %vm931_vm13, %v927_v53, inf }
 0x242   : > { %v2961_v43 = vpop.xlane.xlu1 %1064  ;;  %903 = vmin.xlane.f32.xlu0 %v902_v4  ;;  %v955_v4 = vand.u32 65535, %v2605_v21  ;;  %v2985_v53 = vpop.xlane.xlu0 %1139  ;;  %v972_v21 = vcvt.s32.f32 %v970_v13 }
 0x243   : > { %3838 = vst [vmem:[#allocation74_spill] sm:$0xff] %v2985_v53  ;;  %vm1066_vm6 = vcmp.eq.f32.partialorder %v2702_v63, %v2961_v43  ;;  %vm1141_vm11 = vcmp.eq.f32.partialorder %v2704_v0, %v2985_v53 }
 0x244   : > { %v957_v35 = vcvt.s32.f32 %v955_v4 }
 0x246   : > { %v2966_v12 = vpop.xlane.xlu1 %1094  ;;  %918 = vmin.xlane.f32.xlu0 %v917_v47  ;;  %v962_v25 = vsel %vm961_vm15, %v957_v35, inf  ;;  %v2995_v4 = vpop.xlane.xlu0 %1169  ;;  %v987_v35 = vcvt.s32.f32 %v985_v20 }
 0x247   : > { %3840 = vst [vmem:[#allocation96_spill] sm:$0xff] %v2995_v4  ;;  %vm1096_vm8 = vcmp.eq.f32.partialorder %v2724_v37, %v2966_v12  ;;  %vm1171_vm13 = vcmp.eq.f32.partialorder %v2726_v46, %v2995_v4  ;;  %v3852_v46 = vld [vmem:[#allocation89_spill] sm:$0xff] }
 0x24a   : > { %v2973_v26 = vpop.xlane.xlu1 %1124  ;;  %933 = vmin.xlane.f32.xlu0 %v932_v16  ;;  %v1000_v16 = vand.u32 65535, %v2627_v52  ;;  %v1015_v52 = vand.u32 65535, %v2588_v58  ;;  %v3009_v58 = vpop.xlane.xlu0 %1199 }
 0x24b   : > { %vm1126_vm10 = vcmp.eq.f32.partialorder %v2742_v62, %v2973_v26 }
 0x24c   : > { %v1017_v13 = vcvt.s32.f32 %v1015_v52 }
 0x24e   : > { %v2980_v60 = vpop.xlane.xlu1 %1154  ;;  %948 = vmin.xlane.f32.xlu0 %v947_v36  ;;  %v1002_v36 = vcvt.s32.f32 %v1000_v16  ;;  %v3021_v24 = vpop.xlane.xlu0 %1214 }
 0x24f   : > { %3836 = vst [vmem:[#allocation14_spill] sm:$0xff] %v2980_v60  ;;  %vm1156_vm12 = vcmp.eq.f32.partialorder %v2759_v49, %v2980_v60 }
 0x250   : > { %v1007_v39 = vsel %vm1006_vm2, %v1002_v36, inf  ;;  %v3844_v36 = vld [vmem:[#allocation80_spill] sm:$0xff] }
 0x251   : > { %3845 = vst [vmem:[#allocation80_spill] sm:$0xff] %v3021_v24 }
 0x252   : > { %v2982_v47 = vpop.xlane.xlu1 %1184  ;;  %963 = vmin.xlane.f32.xlu0 %v962_v25  ;;  %v1030_v25 = vand.u32 65535, %v2649_v40  ;;  %v3842_v40 = vld [vmem:[#allocation78_spill] sm:$0xff] }
 0x253   : > { %3837 = vst [vmem:[#allocation72_spill] sm:$0xff] %v2982_v47  ;;  %v1045_v16 = vand.u32 65535, %v3842_v40  ;;  %3843 = vst [vmem:[#allocation78_spill] sm:$0xff] %v3009_v58 }
 0x254   : > { %v1032_v18 = vcvt.s32.f32 %v1030_v25 }
 0x255   : > { %v1047_v6 = vcvt.s32.f32 %v1045_v16  ;;  %v3031_v16 = vpop.xlane.xlu0 %1229 }
 0x256   : > { %v2987_v28 = vpop.xlane.xlu1 %974  ;;  %v1037_v20 = vsel %vm1036_vm4, %v1032_v18, inf  ;;  %vm1465_vm4 = vcmask 39936  }
 0x257   : > { %3839 = vst [vmem:[#allocation76_spill] sm:$0xff] %v2987_v28  ;;  %vm976_vm1 = vcmp.eq.f32.partialorder %v2783_v9, %v2987_v28  ;;  %v1052_v25 = vsel %vm1051_vm5, %v1047_v6, inf  ;;  %v3848_v6 = vld [vmem:[#allocation90_spill] sm:$0xff]  ;;  %vm1498_vm5 = vcmask 48128  }
 0x258   : > { %v977_v45 = vsel %vm976_vm1, %v972_v21, inf  ;;  %v1060_v21 = vand.u32 65535, %v2669_v7  ;;  %v1075_v7 = vand.u32 65535, %v3844_v36  ;;  %vm1186_vm14 = vcmp.eq.f32.partialorder %v3848_v6, %v2982_v47  ;;  %v3849_v36 = vld [vmem:[#allocation85_spill] sm:$0xff] }
 0x259   : > { %978 = vmin.xlane.f32.xlu1 %v977_v45  ;;  %v1090_v45 = vand.u32 65535, %v2691_v33  ;;  %v1105_v33 = vand.u32 65535, %v2652_v30  ;;  %v3043_v0 = vpop.permute.xlu0 %1305  ;;  %vm1216_vm1 = vcmp.eq.f32.partialorder %v3852_v46, %v3021_v24 }
 0x25a   : > { %v2997_v51 = vpop.xlane.xlu1 %989  ;;  %v1062_v1 = vcvt.s32.f32 %v1060_v21  ;;  %v1077_v52 = vcvt.s32.f32 %v1075_v7  ;;  %v3846_v21 = vld [vmem:[#allocation82_spill] sm:$0xff]  ;;  %v1195_v7 = vand.u32 65535, %v3849_v36 }
 0x25b   : > { %3841 = vst [vmem:[#allocation97_spill] sm:$0xff] %v2997_v51  ;;  %vm991_vm0 = vcmp.eq.f32.partialorder %v2787_v17, %v2997_v51  ;;  %v1022_v17 = vsel %vm1021_vm3, %v1017_v13, inf  ;;  %v1092_v63 = vcvt.s32.f32 %v1090_v45  ;;  %v1107_v37 = vcvt.s32.f32 %v1105_v33  ;;  %3847 = vst [vmem:[#allocation82_spill] sm:$0xff] %v3031_v16  ;;  %v3853_v33 = vld [vmem:[#allocation88_spill] sm:$0xff]  ;;  %v3859_v36 = vld [vmem:[#allocation42_spill] sm:$0xff] }
 0x25c   : > { %v992_v9 = vsel %vm991_vm0, %v987_v35, inf  ;;  %v1067_v35 = vsel %vm1066_vm6, %v1062_v1, inf  ;;  %v1082_v18 = vsel %vm1081_vm7, %v1077_v52, inf  ;;  %v1150_v13 = vand.u32 65535, %v2733_v3 }
 0x25d   : > { %1008 = vmin.xlane.f32.xlu1 %v1007_v39  ;;  %993 = vmin.xlane.f32.xlu0 %v992_v9  ;;  %v1120_v39 = vand.u32 65535, %v2713_v31  ;;  %v1097_v9 = vsel %vm1096_vm8, %v1092_v63, inf  ;;  %v1135_v40 = vand.u32 65535, %v3846_v21  ;;  %v1112_v30 = vsel %vm1111_vm9, %v1107_v37, inf  ;;  %v3851_v63 = vld [vmem:[#allocation87_spill] sm:$0xff] }
 0x25e   : > { %v1152_v19 = vcvt.s32.f32 %v1150_v13  ;;  %v1165_v3 = vand.u32 65535, %v2694_v11  ;;  %vm1201_vm15 = vcmp.eq.f32.partialorder %v3851_v63, %v3009_v58  ;;  %v1197_v52 = vcvt.s32.f32 %v1195_v7  ;;  %v3854_v13 = vld [vmem:[#allocation91_spill] sm:$0xff]  ;;  %v3862_v63 = vld [vmem:[#allocation48_spill] sm:$0xff] }
 0x25f   : > { %v1122_v54 = vcvt.s32.f32 %v1120_v39  ;;  %v1137_v62 = vcvt.s32.f32 %v1135_v40  ;;  %vm1231_vm2 = vcmp.eq.f32.partialorder %v3854_v13, %v3031_v16  ;;  %v801_v58 = vcvt.f32.s32 %v2893_v5 }
 0x260   : > { %v1167_v45 = vcvt.s32.f32 %v1165_v3  ;;  %vm1432_vm0 = vcmask 31744   ;;  %vm1399_vm3 = vcmask 15360   ;;  %vm1531_vm6 = vcmask 56320  }
 0x261   : > { %1038 = vmin.xlane.f32.xlu1 %v1037_v20  ;;  %1023 = vmin.xlane.f32.xlu0 %v1022_v17  ;;  %v1127_v31 = vsel %vm1126_vm10, %v1122_v54, inf  ;;  %v1180_v20 = vand.u32 65535, %v2751_v55  ;;  %v1157_v17 = vsel %vm1156_vm12, %v1152_v19, inf  ;;  %v1142_v1 = vsel %vm1141_vm11, %v1137_v62, inf  ;;  %v3061_v19 = vld [vmem:[%s1986_s24 + $0xd8] sm:$0xff] }
 0x262   : > { %v1172_v11 = vsel %vm1171_vm13, %v1167_v45, inf  ;;  %v1202_v54 = vsel %vm1201_vm15, %v1197_v52, inf  ;;  %v3855_v62 = vld [vmem:[#allocation40_spill] sm:$0xff]  ;;  %v3077_v45 = vld [vmem:[%s1986_s24 + $0xe8] sm:$0xff]  ;;  %v3094_v52 = vld [vmem:[%s1986_s24 + $0x60] sm:$0xff] }
 0x263   : > { %v1182_v49 = vcvt.s32.f32 %v1180_v20  ;;  %v589_v20 = vadd.f32 %v3061_v19, %v3855_v62  ;;  %3858 = vst [vmem:[#allocation85_spill] sm:$0xff] %v3077_v45  ;;  %v591_v7 = vadd.f32 %v3077_v45, %v3859_v36 }
 0x265   : > { %1068 = vmin.xlane.f32.xlu1 %v1067_v35  ;;  %1053 = vmin.xlane.f32.xlu0 %v1052_v25  ;;  %v3850_v35 = vld [vmem:[#allocation86_spill] sm:$0xff]  ;;  %v1187_v25 = vsel %vm1186_vm14, %v1182_v49, inf }
 0x266   : > { %v1210_v55 = vand.u32 65535, %v3850_v35  ;;  %v3082_v35 = vld [vmem:[%s1986_s24 + $0x58] sm:$0xff] }
 0x268   : > { %v1212_v39 = vcvt.s32.f32 %v1210_v55  ;;  %v3860_v55 = vld [vmem:[#allocation24_spill] sm:$0xff] }
 0x269   : > { %1098 = vmin.xlane.f32.xlu1 %v1097_v9  ;;  %1083 = vmin.xlane.f32.xlu0 %v1082_v18  ;;  %v1225_v9 = vand.u32 65535, %v3853_v33  ;;  %v3052_v18 = vpop.permute.xlu0 %1311 }
 0x26a   : > { %v1217_v37 = vsel %vm1216_vm1, %v1212_v39, inf  ;;  %v3863_v39 = vld [vmem:[#allocation29_spill] sm:$0xff] }
 0x26b   : > { %v1227_v21 = vcvt.s32.f32 %v1225_v9  ;;  %v574_v33 = vadd.f32 %v3094_v52, %v3863_v39 }
 0x26d   : > { %1128 = vmin.xlane.f32.xlu1 %v1127_v31  ;;  %1113 = vmin.xlane.f32.xlu0 %v1112_v30  ;;  %v1232_v40 = vsel %vm1231_vm2, %v1227_v21, inf  ;;  %v3056_v31 = vpop.permute.xlu0 %1335  ;;  %v3108_v21 = vld [vmem:[%s1986_s24 + $0x68] sm:$0xff] }
 0x271   : > { %1158 = vmin.xlane.f32.xlu1 %v1157_v17  ;;  %1143 = vmin.xlane.f32.xlu0 %v1142_v1  ;;  %v3058_v30 = vpop.permute.xlu0 %1339  ;;  %v3069_v17 = vld [vmem:[%s1986_s24 + $0xe0] sm:$0xff] }
 0x272   : > { %3856 = vst [vmem:[#allocation90_spill] sm:$0xff] %v3069_v17  ;;  %v3857_v1 = vld [vmem:[#allocation45_spill] sm:$0xff] }
 0x273   : > { %v590_v6 = vadd.f32 %v3069_v17, %v3857_v1 }
 0x275   : > { %1188 = vmin.xlane.f32.xlu1 %v1187_v25  ;;  %1173 = vmin.xlane.f32.xlu0 %v1172_v11  ;;  %v3065_v3 = vpop.permute.xlu0 %1343  ;;  %v573_v25 = vadd.f32 %v3082_v35, %v3860_v55  ;;  %v3089_v11 = vld [vmem:[%s1986_s24 + $0xf0] sm:$0xff] }
 0x276   : > { %3861 = vst [vmem:[#allocation86_spill] sm:$0xff] %v3089_v11  ;;  %v592_v46 = vadd.f32 %v3089_v11, %v3862_v63 }
 0x279   : > { %1203 = vmin.xlane.f32.xlu0 %v1202_v54  ;;  %1218 = vmin.xlane.f32.xlu1 %v1217_v37  ;;  %v3074_v49 = vpop.permute.xlu0 %1315  ;;  %v3103_v54 = vld [vmem:[%s1986_s24 + $0xf8] sm:$0xff] }
 0x27a   : > { %3864 = vst [vmem:[#allocation87_spill] sm:$0xff] %v3103_v54  ;;  %v3865_v37 = vld [vmem:[#allocation44_spill] sm:$0xff] }
 0x27b   : > { %v593_v13 = vadd.f32 %v3103_v54, %v3865_v37  ;;  %v3123_v54 = vld [vmem:[%s1986_s24 + $0x78] sm:$0xff] }
 0x27c   : > { %v3868_v37 = vld [vmem:[#allocation28_spill] sm:$0xff] }
 0x27d   : > { %1233 = vmin.xlane.f32.xlu0 %v1232_v40  ;;  %v3098_v9 = vpop.permute.xlu0 %1317  ;;  %v3866_v40 = vld [vmem:[#allocation26_spill] sm:$0xff]  ;;  %v577_v11 = vadd.f32 %v3123_v54, %v3868_v37 }
 0x28a   : > { %1357 = vrot.lane.b32.xlu1 %v589_v20, %s1914_s27  ;;  %v575_v20 = vadd.f32 %v3108_v21, %v3866_v40 }
 0x28e   : > { %1359 = vrot.lane.b32.xlu1 %v590_v6, %s1914_s27  ;;  %v3113_v6 = vpop.permute.xlu0 %1319 }
 0x292   : > { %1361 = vrot.lane.b32.xlu1 %v591_v7, %s1914_s27  ;;  %v3117_v7 = vld [vmem:[%s1986_s24 + $0x70] sm:$0xff]  ;;  %v3127_v63 = vpop.permute.xlu0 %1321 }
 0x293   : > { %1325 = vrot.lane.b32.xlu0 %v573_v25, %s1914_s27  ;;  %v3867_v25 = vld [vmem:[#allocation31_spill] sm:$0xff] }
 0x296   : > { %1363 = vrot.lane.b32.xlu1 %v592_v46, %s1914_s27  ;;  %v576_v46 = vadd.f32 %v3117_v7, %v3867_v25  ;;  %v3130_v16 = vpop.permute.xlu0 %1323 }
 0x297   : > { %1327 = vrot.lane.b32.xlu0 %v574_v33, %s1914_s27  ;;  %v1304_v33 = vpop.permute.xlu1 %1303 }
 0x29a   : > { %1365 = vrot.lane.b32.xlu1 %v593_v13, %s1914_s27 }
 0x29b   : > { %1329 = vrot.lane.b32.xlu0 %v575_v20, %s1914_s27  ;;  %v1308_v13 = vpop.permute.xlu1 %1307  ;;  %v771_v20 = vcvt.f32.s32 %v2895_v32  ;;  %v530_v32 = vsub.f32 %v3870_v56, %v3869_v34 }
 0x29d   : > { %v772_v51 = vshll.u32 %v771_v20, 16  ;;  %v816_v20 = vcvt.f32.s32 %v2911_v10 }
 0x29f   : > { %1331 = vrot.lane.b32.xlu0 %v576_v46, %s1914_s27  ;;  %v1310_v36 = vpop.permute.xlu1 %1309  ;;  %v786_v46 = vcvt.f32.s32 %v2902_v38  ;;  %v1400_v38 = vsel %vm1399_vm3, %v530_v32, %v1304_v33  ;;  %v817_v34 = vshll.u32 %v816_v20, 16  ;;  %v846_v20 = vcvt.f32.s32 %v2923_v44 }
 0x2a1   : > { %v787_v4 = vshll.u32 %v786_v46, 16 }
 0x2a3   : > { %1333 = vrot.lane.b32.xlu0 %v577_v11, %s1914_s27  ;;  %v3135_v17 = vpop.permute.xlu1 %1313 }
 0x2a7   : > { %v3144_v46 = vpop.permute.xlu1 %1337 }
 0x2ab   : > { %v769_v45 = vpop.xlane.xlu0 %768 }
 0x2ac   : > { %v770_v24 = vcvt.f32.s32 %v769_v45  ;;  %v802_v45 = vshll.u32 %v801_v58, 16  ;;  %v3873_v58 = vld [vmem:[#allocation50_spill] sm:$0xff] }
 0x2ae   : > { %v773_v28 = vadd.s32 %v772_v51, %v770_v24 }
 0x2af   : > { %v784_v47 = vpop.xlane.xlu0 %783 }
 0x2b0   : > { %v785_v60 = vcvt.f32.s32 %v784_v47  ;;  %v1239_v11 = vcvt.s32.f32 %v773_v28  ;;  %v3871_v28 = vld [vmem:[#allocation15_spill] sm:$0xff] }
 0x2b2   : > { %v788_v1 = vadd.s32 %v787_v4, %v785_v60  ;;  %v1433_v47 = vsel %vm1432_vm0, %v1400_v38, %v1239_v11  ;;  %v3872_v60 = vld [vmem:[#allocation92_spill] sm:$0xff]  ;;  %v3875_v38 = vld [vmem:[#allocation95_spill] sm:$0xff] }
 0x2b3   : > { %v799_v53 = vpop.xlane.xlu0 %798  ;;  %v531_v4 = vsub.f32 %v3872_v60, %v3871_v28  ;;  %v1466_v33 = vsel %vm1465_vm4, %v1433_v47, %v3873_v58  ;;  %v3876_v47 = vld [vmem:[#allocation46_spill] sm:$0xff]  ;;  %v3877_v58 = vld [vmem:[#allocation16_spill] sm:$0xff] }
 0x2b4   : > { %v800_v22 = vcvt.f32.s32 %v799_v53  ;;  %v1240_v5 = vcvt.s32.f32 %v788_v1  ;;  %v831_v53 = vcvt.f32.s32 %v2916_v48  ;;  %v1499_v48 = vsel %vm1498_vm5, %v1466_v33, 0.0 }
 0x2b5   : > { %v1401_v10 = vsel %vm1399_vm3, %v531_v4, %v3043_v0  ;;  %v3157_v4 = vpop.permute.xlu1 %1341  ;;  %v1532_v44 = vsel %vm1531_vm6, %v1499_v48, 0.0  ;;  %v847_v33 = vshll.u32 %v846_v20, 16 }
 0x2b6   : > { %v803_v51 = vadd.s32 %v802_v45, %v800_v22  ;;  %v1434_v22 = vsel %vm1432_vm0, %v1401_v10, %v1240_v5  ;;  %v3874_v45 = vld [vmem:[#allocation19_spill] sm:$0xff] }
 0x2b7   : > { %v814_v24 = vpop.xlane.xlu0 %813  ;;  %v532_v28 = vsub.f32 %v3875_v38, %v3874_v45  ;;  %v1467_v5 = vsel %vm1465_vm4, %v1434_v22, %v3876_v47  ;;  %v861_v38 = vcvt.f32.s32 %v2932_v57  ;;  %v3879_v22 = vld [vmem:[#allocation52_spill] sm:$0xff]  ;;  %v3880_v47 = vld [vmem:[#allocation21_spill] sm:$0xff] }
 0x2b8   : > { %v815_v56 = vcvt.f32.s32 %v814_v24  ;;  %v1241_v1 = vcvt.s32.f32 %v803_v51  ;;  %v832_v24 = vshll.u32 %v831_v53, 16 }
 0x2b9   : > { %v1402_v0 = vsel %vm1399_vm3, %v532_v28, %v1308_v13  ;;  %v1500_v13 = vsel %vm1498_vm5, %v1467_v5, 0.0  ;;  %v3173_v48 = vpop.permute.xlu1 %1345  ;;  %v876_v5 = vcvt.f32.s32 %v2900_v15 }
 0x2ba   : > { %v818_v11 = vadd.s32 %v817_v34, %v815_v56  ;;  %v1435_v51 = vsel %vm1432_vm0, %v1402_v0, %v1241_v1  ;;  %v1533_v57 = vsel %vm1531_vm6, %v1500_v13, 0.0 }
 0x2bb   : > { %v829_v32 = vpop.xlane.xlu0 %828  ;;  %v1468_v1 = vsel %vm1465_vm4, %v1435_v51, %v3879_v22  ;;  %v3884_v22 = vld [vmem:[#allocation8_spill] sm:$0xff] }
 0x2bc   : > { %v830_v60 = vcvt.f32.s32 %v829_v32  ;;  %v1242_v56 = vcvt.s32.f32 %v818_v11  ;;  %v3878_v32 = vld [vmem:[#allocation6_spill] sm:$0xff] }
 0x2bd   : > { %v533_v53 = vsub.f32 %v3878_v32, %v3877_v58  ;;  %v862_v32 = vshll.u32 %v861_v38, 16  ;;  %v877_v38 = vshll.u32 %v876_v5, 16  ;;  %v3887_v5 = vld [vmem:[#allocation10_spill] sm:$0xff] }
 0x2be   : > { %v833_v34 = vadd.s32 %v832_v24, %v830_v60 }
 0x2bf   : > { %v844_v10 = vpop.xlane.xlu0 %843  ;;  %v1403_v28 = vsel %vm1399_vm3, %v533_v53, %v1310_v36  ;;  %v1501_v36 = vsel %vm1498_vm5, %v1468_v1, 0.0  ;;  %v891_v1 = vcvt.f32.s32 %v2909_v50 }
 0x2c0   : > { %v845_v45 = vcvt.f32.s32 %v844_v10  ;;  %v1436_v11 = vsel %vm1432_vm0, %v1403_v28, %v1242_v56  ;;  %v1243_v60 = vcvt.s32.f32 %v833_v34  ;;  %v3881_v10 = vld [vmem:[#allocation94_spill] sm:$0xff]  ;;  %v3882_v56 = vld [vmem:[#allocation55_spill] sm:$0xff]  ;;  %v1534_v15 = vsel %vm1531_vm6, %v1501_v36, 0.0 }
 0x2c1   : > { %1564 = vxpose.xlu0.b32.start [1/16] (narrow) %v1532_v44, 8  ;;  %v534_v58 = vsub.f32 %v3881_v10, %v3880_v47  ;;  %v1469_v34 = vsel %vm1465_vm4, %v1436_v11, %v3882_v56  ;;  %v3883_v28 = vld [vmem:[#allocation18_spill] sm:$0xff]  ;;  %v3190_v47 = vpop.permute.xlu1 %1347  ;;  %v892_v56 = vshll.u32 %v891_v1, 16 }
 0x2c2   : > { %v848_v24 = vadd.s32 %v847_v33, %v845_v45  ;;  %v535_v13 = vsub.f32 %v3884_v22, %v3883_v28 }
 0x2c3   : > { %v859_v0 = vpop.xlane.xlu0 %858  ;;  %v1404_v51 = vsel %vm1399_vm3, %v534_v58, %v3052_v18  ;;  %v1502_v18 = vsel %vm1498_vm5, %v1469_v34, 0.0  ;;  %v906_v34 = vcvt.f32.s32 %v2914_v14 }
 0x2c4   : > { %v860_v20 = vcvt.f32.s32 %v859_v0  ;;  %v1437_v53 = vsel %vm1432_vm0, %v1404_v51, %v1243_v60  ;;  %v1244_v45 = vcvt.s32.f32 %v848_v24  ;;  %v1405_v11 = vsel %vm1399_vm3, %v535_v13, %v3135_v17  ;;  %v3885_v60 = vld [vmem:[#allocation47_spill] sm:$0xff] }
 0x2c5   : > { %1565 = vxpose.xlu0.b32.cont [2/16] (narrow) %v1533_v57, 8  ;;  %v1470_v24 = vsel %vm1465_vm4, %v1437_v53, %v3885_v60  ;;  %v1535_v51 = vsel %vm1531_vm6, %v1502_v18, 0.0  ;;  %v3207_v1 = vpop.permute.xlu1 %1349  ;;  %v921_v60 = vcvt.f32.s32 %v2921_v59 }
 0x2c6   : > { %v863_v44 = vadd.s32 %v862_v32, %v860_v20  ;;  %v1438_v10 = vsel %vm1432_vm0, %v1405_v11, %v1244_v45  ;;  %v3886_v32 = vld [vmem:[#allocation23_spill] sm:$0xff]  ;;  %v1503_v17 = vsel %vm1498_vm5, %v1470_v24, 0.0  ;;  %v907_v11 = vshll.u32 %v906_v34, 16 }
 0x2c7   : > { %v874_v33 = vpop.xlane.xlu0 %873  ;;  %v536_v36 = vsub.f32 %v3887_v5, %v3886_v32  ;;  %v1536_v18 = vsel %vm1531_vm6, %v1503_v17, 0.0  ;;  %v922_v34 = vshll.u32 %v921_v60, 16 }
 0x2c8   : > { %v875_v0 = vcvt.f32.s32 %v874_v33  ;;  %v1245_v58 = vcvt.s32.f32 %v863_v44  ;;  %v3888_v33 = vld [vmem:[#allocation57_spill] sm:$0xff] }
 0x2c9   : > { %1566 = vxpose.xlu0.b32.cont [3/16] (narrow) %v1534_v15, 8  ;;  %v1406_v53 = vsel %vm1399_vm3, %v536_v36, %v3074_v49  ;;  %v1471_v45 = vsel %vm1465_vm4, %v1438_v10, %v3888_v33  ;;  %v3890_v15 = vld [vmem:[#allocation5_spill] sm:$0xff]  ;;  %v3894_v33 = vld [vmem:[#allocation60_spill] sm:$0xff] }
 0x2ca   : > { %v878_v20 = vadd.s32 %v877_v38, %v875_v0  ;;  %v1439_v44 = vsel %vm1432_vm0, %v1406_v53, %v1245_v58  ;;  %v3889_v0 = vld [vmem:[#allocation20_spill] sm:$0xff]  ;;  %v1504_v49 = vsel %vm1498_vm5, %v1471_v45, 0.0  ;;  %v3891_v10 = vld [vmem:[#allocation49_spill] sm:$0xff]  ;;  %v3223_v53 = vpop.permute.xlu1 %1351 }
 0x2cb   : > { %v889_v57 = vpop.xlane.xlu0 %888  ;;  %v537_v38 = vsub.f32 %v3890_v15, %v3889_v0  ;;  %v1472_v58 = vsel %vm1465_vm4, %v1439_v44, %v3891_v10  ;;  %v3892_v36 = vld [vmem:[#allocation25_spill] sm:$0xff]  ;;  %v1537_v59 = vsel %vm1531_vm6, %v1504_v49, 0.0  ;;  %v3898_v10 = vld [vmem:[#allocation12_spill] sm:$0xff] }
 0x2cc   : > { %v890_v50 = vcvt.f32.s32 %v889_v57  ;;  %v1246_v28 = vcvt.s32.f32 %v878_v20  ;;  %v1505_v17 = vsel %vm1498_vm5, %v1472_v58, 0.0  ;;  %v3896_v0 = vld [vmem:[#allocation9_spill] sm:$0xff]  ;;  %v540_v58 = vsub.f32 %v3898_v10, %v3823_v23 }
 0x2cd   : > { %1567 = vxpose.xlu0.b32.cont [4/16] (narrow) %v1535_v51, 8  ;;  %v1407_v24 = vsel %vm1399_vm3, %v537_v38, %v3098_v9  ;;  %v1538_v38 = vsel %vm1531_vm6, %v1505_v17, 0.0  ;;  %v1071_v10 = vcvt.f32.s32 %v2961_v43 }
 0x2ce   : > { %v893_v22 = vadd.s32 %v892_v56, %v890_v50  ;;  %v1440_v20 = vsel %vm1432_vm0, %v1407_v24, %v1246_v28  ;;  %v3893_v50 = vld [vmem:[#allocation7_spill] sm:$0xff] }
 0x2cf   : > { %v904_v13 = vpop.xlane.xlu0 %903  ;;  %v538_v51 = vsub.f32 %v3893_v50, %v3892_v36  ;;  %v1473_v45 = vsel %vm1465_vm4, %v1440_v20, %v3894_v33  ;;  %v3241_v20 = vpop.permute.xlu1 %1353 }
 0x2d0   : > { %v905_v14 = vcvt.f32.s32 %v904_v13  ;;  %v1247_v57 = vcvt.s32.f32 %v893_v22  ;;  %v3895_v13 = vld [vmem:[#allocation22_spill] sm:$0xff] }
 0x2d1   : > { %1568 = vxpose.xlu0.b32.cont [5/16] (narrow) %v1536_v18, 8  ;;  %v1408_v9 = vsel %vm1399_vm3, %v538_v51, %v3113_v6  ;;  %v539_v15 = vsub.f32 %v3896_v0, %v3895_v13 }
 0x2d2   : > { %v908_v32 = vadd.s32 %v907_v11, %v905_v14  ;;  %v1441_v44 = vsel %vm1432_vm0, %v1408_v9, %v1247_v57  ;;  %v1506_v14 = vsel %vm1498_vm5, %v1473_v45, 0.0  ;;  %v3897_v11 = vld [vmem:[#allocation51_spill] sm:$0xff] }
 0x2d3   : > { %v919_v5 = vpop.xlane.xlu0 %918  ;;  %v1409_v6 = vsel %vm1399_vm3, %v539_v15, %v3127_v63  ;;  %v1474_v60 = vsel %vm1465_vm4, %v1441_v44, %v3897_v11  ;;  %v1539_v57 = vsel %vm1531_vm6, %v1506_v14, 0.0  ;;  %v1410_v63 = vsel %vm1399_vm3, %v540_v58, %v3130_v16  ;;  %v1821_v11 = vld [vmem:[%s1986_s24 + $0x80] sm:$0xff] }
 0x2d4   : > { %v920_v56 = vcvt.f32.s32 %v919_v5  ;;  %v1248_v28 = vcvt.s32.f32 %v908_v32  ;;  %v1507_v32 = vsel %vm1498_vm5, %v1474_v60, 0.0  ;;  %v3899_v5 = vld [vmem:[#allocation62_spill] sm:$0xff]  ;;  %v1011_v44 = vcvt.f32.s32 %v2947_v27  ;;  %v3901_v60 = vld [vmem:[#allocation33_spill] sm:$0xff] }
 0x2d5   : > { %1569 = vxpose.xlu0.b32.cont [6/16] (narrow) %v1537_v59, 8  ;;  %v3254_v59 = vpop.permute.xlu1 %1355  ;;  %v1056_v27 = vcvt.f32.s32 %v2957_v42 }
 0x2d6   : > { %v923_v22 = vadd.s32 %v922_v34, %v920_v56  ;;  %v1442_v49 = vsel %vm1432_vm0, %v1409_v6, %v1248_v28  ;;  %v1540_v56 = vsel %vm1531_vm6, %v1507_v32, 0.0  ;;  %v3900_v34 = vld [vmem:[#allocation53_spill] sm:$0xff]  ;;  %v1012_v15 = vshll.u32 %v1011_v44, 16 }
 0x2d7   : > { %v3234_v18 = vpop.xlane.xlu0 %933  ;;  %v1475_v36 = vsel %vm1465_vm4, %v1442_v49, %v3899_v5  ;;  %v546_v49 = vsub.f32 %v1821_v11, %v3901_v60  ;;  %v1086_v44 = vcvt.f32.s32 %v2968_v41  ;;  %v1824_v60 = vld [vmem:[%s1986_s24 + $0x98] sm:$0xff] }
 0x2d8   : > { %v1249_v24 = vcvt.s32.f32 %v923_v22  ;;  %v1508_v23 = vsel %vm1498_vm5, %v1475_v36, 0.0  ;;  %v1026_v22 = vcvt.f32.s32 %v2949_v61  ;;  %v1822_v36 = vld [vmem:[%s1986_s24 + $0x88] sm:$0xff] }
 0x2d9   : > { %1570 = vxpose.xlu0.b32.cont [7/16] (narrow) %v1538_v38, 8  ;;  %v1541_v16 = vsel %vm1531_vm6, %v1508_v23, 0.0  ;;  %v1041_v38 = vcvt.f32.s32 %v2954_v2  ;;  %v1823_v23 = vld [vmem:[%s1986_s24 + $0x90] sm:$0xff] }
 0x2da   : > { %v1443_v50 = vsel %vm1432_vm0, %v1410_v63, %v1249_v24  ;;  %v1027_v24 = vshll.u32 %v1026_v22, 16 }
 0x2db   : > { %v3250_v51 = vpop.xlane.xlu0 %948  ;;  %v1476_v17 = vsel %vm1465_vm4, %v1443_v50, %v3900_v34  ;;  %v3902_v50 = vld [vmem:[#allocation30_spill] sm:$0xff]  ;;  %v3903_v34 = vld [vmem:[#allocation35_spill] sm:$0xff] }
 0x2dc   : > { %v1509_v9 = vsel %vm1498_vm5, %v1476_v17, 0.0  ;;  %v547_v2 = vsub.f32 %v1822_v36, %v3902_v50  ;;  %v548_v17 = vsub.f32 %v1823_v23, %v3903_v34  ;;  %v1087_v50 = vshll.u32 %v1086_v44, 16 }
 0x2dd   : > { %1571 = vxpose.xlu0.b32.cont [8/16] (narrow) %v1539_v57, 8  ;;  %v1542_v28 = vsel %vm1531_vm6, %v1509_v9, 0.0  ;;  %v1042_v57 = vshll.u32 %v1041_v38, 16  ;;  %v1057_v9 = vshll.u32 %v1056_v27, 16 }
 0x2de   : > { %v1417_v41 = vsel %vm1399_vm3, %v547_v2, %v3144_v46  ;;  %v1101_v46 = vcvt.f32.s32 %v2966_v12 }
 0x2df   : > { %v3260_v33 = vpop.xlane.xlu0 %963 }
 0x2e1   : > { %1572 = vxpose.xlu0.b32.cont [9/16] (narrow) %v1540_v56, 8  ;;  %v1416_v56 = vsel %vm1399_vm3, %v546_v49, %v3056_v31  ;;  %v3905_v49 = vld [vmem:[#allocation32_spill] sm:$0xff] }
 0x2e5   : > { %1573 = vxpose.xlu0.b32.cont [10/16] (narrow) %v1541_v16, 8 }
 0x2e6   : > { %v3262_v45 = vpop.xlane.xlu1 %978 }
 0x2e9   : > { %1574 = vxpose.xlu0.b32.cont [11/16] (narrow) %v1542_v28, 8  ;;  %v1072_v28 = vshll.u32 %v1071_v10, 16 }
 0x2ea   : > { %v1009_v13 = vpop.xlane.xlu1 %1008  ;;  %v3267_v0 = vpop.xlane.xlu0 %993 }
 0x2eb   : > { %v1010_v14 = vcvt.f32.s32 %v1009_v13 }
 0x2ed   : > { %v1013_v6 = vadd.s32 %v1012_v15, %v1010_v14  ;;  %v3904_v15 = vld [vmem:[#allocation58_spill] sm:$0xff] }
 0x2ee   : > { %v1039_v58 = vpop.xlane.xlu1 %1038  ;;  %v1024_v61 = vpop.xlane.xlu0 %1023 }
 0x2ef   : > { %v1255_v32 = vcvt.s32.f32 %v1013_v6  ;;  %v1040_v63 = vcvt.f32.s32 %v1039_v58  ;;  %v1025_v5 = vcvt.f32.s32 %v1024_v61  ;;  %v549_v58 = vsub.f32 %v1824_v60, %v3905_v49 }
 0x2f0   : > { %v1116_v60 = vcvt.f32.s32 %v2976_v29  ;;  %v1102_v49 = vshll.u32 %v1101_v46, 16 }
 0x2f1   : > { %v1449_v42 = vsel %vm1432_vm0, %v1416_v56, %v1255_v32  ;;  %v1043_v16 = vadd.s32 %v1042_v57, %v1040_v63  ;;  %v1028_v43 = vadd.s32 %v1027_v24, %v1025_v5  ;;  %v1418_v24 = vsel %vm1399_vm3, %v548_v17, %v3058_v30  ;;  %v1825_v63 = vld [vmem:[%s1986_s24 + $0xa0] sm:$0xff]  ;;  %v3907_v30 = vld [vmem:[#allocation71_spill] sm:$0xff] }
 0x2f2   : > { %v1069_v22 = vpop.xlane.xlu1 %1068  ;;  %v1054_v13 = vpop.xlane.xlu0 %1053  ;;  %v1482_v38 = vsel %vm1465_vm4, %v1449_v42, %v3904_v15  ;;  %v3906_v5 = vld [vmem:[#allocation37_spill] sm:$0xff] }
 0x2f3   : > { %v1257_v14 = vcvt.s32.f32 %v1043_v16  ;;  %v1256_v31 = vcvt.s32.f32 %v1028_v43  ;;  %v1070_v6 = vcvt.f32.s32 %v1069_v22  ;;  %v1055_v11 = vcvt.f32.s32 %v1054_v13 }
 0x2f4   : > { %v1515_v27 = vsel %vm1498_vm5, %v1482_v38, 0.0  ;;  %v550_v36 = vsub.f32 %v1825_v63, %v3906_v5  ;;  %v1827_v63 = vld [vmem:[%s1986_s24 + $0xb8] sm:$0xff] }
 0x2f5   : > { %v1451_v10 = vsel %vm1432_vm0, %v1418_v24, %v1257_v14  ;;  %v1450_v61 = vsel %vm1432_vm0, %v1417_v41, %v1256_v31  ;;  %v1073_v57 = vadd.s32 %v1072_v28, %v1070_v6  ;;  %v1058_v32 = vadd.s32 %v1057_v9, %v1055_v11  ;;  %v3908_v28 = vld [vmem:[#allocation59_spill] sm:$0xff]  ;;  %v1826_v41 = vld [vmem:[%s1986_s24 + $0xa8] sm:$0xff]  ;;  %v3911_v5 = vld [vmem:[#allocation36_spill] sm:$0xff] }
 0x2f6   : > { %v1548_v56 = vsel %vm1531_vm6, %v1515_v27, 0.0  ;;  %v1099_v23 = vpop.xlane.xlu1 %1098  ;;  %v1084_v34 = vpop.xlane.xlu0 %1083  ;;  %v1483_v17 = vsel %vm1465_vm4, %v1450_v61, %v3907_v30  ;;  %v1420_v43 = vsel %vm1399_vm3, %v550_v36, %v3065_v3  ;;  %v1419_v9 = vsel %vm1399_vm3, %v549_v58, %v3157_v4  ;;  %v3909_v27 = vld [vmem:[#allocation34_spill] sm:$0xff]  ;;  %v1828_v30 = vld [vmem:[%s1986_s24 + $0xb0] sm:$0xff] }
 0x2f7   : > { %v1259_v2 = vcvt.s32.f32 %v1073_v57  ;;  %v1258_v42 = vcvt.s32.f32 %v1058_v32  ;;  %1596 = vxpose.xlu1.b32.start [1/16] (narrow) %v1548_v56, 8  ;;  %v1085_v16 = vcvt.f32.s32 %v1084_v34  ;;  %v1516_v44 = vsel %vm1498_vm5, %v1483_v17, 0.0  ;;  %v3910_v57 = vld [vmem:[#allocation73_spill] sm:$0xff]  ;;  %v3913_v17 = vld [vmem:[#allocation39_spill] sm:$0xff] }
 0x2f8   : > { %v1484_v22 = vsel %vm1465_vm4, %v1451_v10, %v3908_v28  ;;  %v1100_v15 = vcvt.f32.s32 %v1099_v23  ;;  %v1549_v4 = vsel %vm1531_vm6, %v1516_v44, 0.0  ;;  %v551_v10 = vsub.f32 %v1826_v41, %v3909_v27  ;;  %v3912_v23 = vld [vmem:[#allocation11_spill] sm:$0xff]  ;;  %v3917_v41 = vld [vmem:[#allocation61_spill] sm:$0xff] }
 0x2f9   : > { %v1453_v13 = vsel %vm1432_vm0, %v1420_v43, %v1259_v2  ;;  %v1452_v12 = vsel %vm1432_vm0, %v1419_v9, %v1258_v42  ;;  %v1088_v38 = vadd.s32 %v1087_v50, %v1085_v16  ;;  %v1517_v58 = vsel %vm1498_vm5, %v1484_v22, 0.0  ;;  %v3332_v2 = vld [vmem:[%s1986_s24 + $0xc0] sm:$0xff] }
 0x2fa   : > { %v1129_v31 = vpop.xlane.xlu1 %1128  ;;  %v1114_v6 = vpop.xlane.xlu0 %1113  ;;  %v1485_v32 = vsel %vm1465_vm4, %v1452_v12, %v3910_v57  ;;  %v553_v29 = vsub.f32 %v1827_v63, %v3911_v5  ;;  %v1103_v36 = vadd.s32 %v1102_v49, %v1100_v15  ;;  %v552_v46 = vsub.f32 %v1828_v30, %v3913_v17  ;;  %v3914_v42 = vld [vmem:[#allocation41_spill] sm:$0xff]  ;;  %v3351_v30 = vld [vmem:[%s1986_s24 + $0xd0] sm:$0xff]  ;;  %v3919_v17 = vld [vmem:[#allocation38_spill] sm:$0xff] }
 0x2fb   : > { %1597 = vxpose.xlu1.b32.cont [2/16] (narrow) %v1549_v4, 8  ;;  %v1260_v50 = vcvt.s32.f32 %v1088_v38  ;;  %v1115_v56 = vcvt.f32.s32 %v1114_v6  ;;  %v554_v16 = vsub.f32 %v3332_v2, %v3914_v42  ;;  %v1550_v43 = vsel %vm1531_vm6, %v1517_v58, 0.0  ;;  %v3915_v38 = vld [vmem:[#allocation27_spill] sm:$0xff]  ;;  %v3916_v6 = vld [vmem:[#allocation13_spill] sm:$0xff] }
 0x2fc   : > { %v1117_v22 = vshll.u32 %v1116_v60, 16  ;;  %v1131_v12 = vcvt.f32.s32 %v2973_v26  ;;  %v1518_v15 = vsel %vm1498_vm5, %v1485_v32, 0.0  ;;  %v936_v4 = vcvt.f32.s32 %v3915_v38  ;;  %v3918_v26 = vld [vmem:[#allocation43_spill] sm:$0xff]  ;;  %v3920_v38 = vld [vmem:[#allocation74_spill] sm:$0xff] }
 0x2fd   : > { %v951_v49 = vcvt.f32.s32 %v3916_v6  ;;  %v1421_v58 = vsel %vm1399_vm3, %v551_v10, %v3173_v48  ;;  %v1486_v27 = vsel %vm1465_vm4, %v1453_v13, %v3917_v41  ;;  %v1261_v57 = vcvt.s32.f32 %v1103_v36  ;;  %v3921_v13 = vld [vmem:[#allocation45_spill] sm:$0xff]  ;;  %v3922_v36 = vld [vmem:[#allocation90_spill] sm:$0xff] }
 0x2fe   : > { %v3337_v9 = vpop.xlane.xlu1 %1158  ;;  %v1144_v44 = vpop.xlane.xlu0 %1143  ;;  %v1454_v63 = vsel %vm1432_vm0, %v1421_v58, %v1260_v50  ;;  %v1130_v5 = vcvt.f32.s32 %v1129_v31  ;;  %v1118_v60 = vadd.s32 %v1117_v22, %v1115_v56  ;;  %v1146_v6 = vcvt.f32.s32 %v3920_v38  ;;  %v3923_v31 = vld [vmem:[#allocation96_spill] sm:$0xff]  ;;  %v3924_v38 = vld [vmem:[#allocation75_spill] sm:$0xff] }
 0x2ff   : > { %1598 = vxpose.xlu1.b32.cont [3/16] (narrow) %v1550_v43, 8  ;;  %v966_v43 = vcvt.f32.s32 %v3919_v17  ;;  %v1551_v24 = vsel %vm1531_vm6, %v1518_v15, 0.0  ;;  %v1176_v56 = vcvt.f32.s32 %v3923_v31  ;;  %v1132_v22 = vshll.u32 %v1131_v12, 16  ;;  %v3926_v31 = vld [vmem:[#allocation14_spill] sm:$0xff] }
 0x300   : > { %v1519_v58 = vsel %vm1498_vm5, %v1486_v27, 0.0  ;;  %v937_v41 = vshll.u32 %v936_v4, 16  ;;  %v952_v61 = vshll.u32 %v951_v49, 16  ;;  %v1422_v17 = vsel %vm1399_vm3, %v552_v46, %v3190_v47  ;;  %v3925_v47 = vld [vmem:[#allocation78_spill] sm:$0xff] }
 0x301   : > { %v1487_v15 = vsel %vm1465_vm4, %v1454_v63, %v3924_v38  ;;  %v1455_v3 = vsel %vm1432_vm0, %v1422_v17, %v1261_v57  ;;  %v1133_v28 = vadd.s32 %v1132_v22, %v1130_v5  ;;  %v1262_v11 = vcvt.s32.f32 %v1118_v60  ;;  %v3927_v5 = vld [vmem:[#allocation72_spill] sm:$0xff] }
 0x302   : > { %v3358_v48 = vpop.xlane.xlu1 %1188  ;;  %v3360_v10 = vpop.xlane.xlu0 %1173  ;;  %v1145_v32 = vcvt.f32.s32 %v1144_v44  ;;  %v967_v50 = vshll.u32 %v966_v43, 16  ;;  %v1147_v14 = vshll.u32 %v1146_v6, 16  ;;  %v935_v12 = vcvt.f32.s32 %v3234_v18  ;;  %v3928_v60 = vld [vmem:[#allocation76_spill] sm:$0xff]  ;;  %v3929_v6 = vld [vmem:[#allocation63_spill] sm:$0xff] }
 0x303   : > { %1599 = vxpose.xlu1.b32.cont [4/16] (narrow) %v1551_v24, 8  ;;  %v1552_v24 = vsel %vm1531_vm6, %v1519_v58, 0.0  ;;  %v1177_v49 = vshll.u32 %v1176_v56, 16  ;;  %v1206_v46 = vcvt.f32.s32 %v3925_v47  ;;  %v1161_v63 = vcvt.f32.s32 %v3926_v31  ;;  %v3930_v47 = vld [vmem:[#allocation97_spill] sm:$0xff] }
 0x304   : > { %v1520_v57 = vsel %vm1498_vm5, %v1487_v15, 0.0  ;;  %v1191_v44 = vcvt.f32.s32 %v3927_v5  ;;  %v981_v43 = vcvt.f32.s32 %v3928_v60  ;;  %v1423_v18 = vsel %vm1399_vm3, %v553_v29, %v3207_v1  ;;  %v3931_v29 = vld [vmem:[#allocation80_spill] sm:$0xff] }
 0x305   : > { %v1488_v22 = vsel %vm1465_vm4, %v1455_v3, %v3929_v6  ;;  %v1263_v58 = vcvt.s32.f32 %v1133_v28  ;;  %v1456_v56 = vsel %vm1432_vm0, %v1423_v18, %v1262_v11  ;;  %v1160_v17 = vcvt.f32.s32 %v3337_v9 }
 0x306   : > { %v3373_v27 = vpop.xlane.xlu1 %1218  ;;  %v3375_v4 = vpop.xlane.xlu0 %1203  ;;  %v1148_v38 = vadd.s32 %v1147_v14, %v1145_v32  ;;  %v938_v31 = vadd.s32 %v937_v41, %v935_v12  ;;  %v950_v15 = vcvt.f32.s32 %v3250_v51  ;;  %v1553_v5 = vsel %vm1531_vm6, %v1520_v57, 0.0  ;;  %v3932_v32 = vld [vmem:[#allocation77_spill] sm:$0xff] }
 0x307   : > { %1600 = vxpose.xlu1.b32.cont [5/16] (narrow) %v1552_v24, 8  ;;  %v996_v24 = vcvt.f32.s32 %v3930_v47  ;;  %v3393_v34 = vshll.u32 %v1206_v46, 16  ;;  %v1162_v1 = vshll.u32 %v1161_v63, 16  ;;  %v1221_v3 = vcvt.f32.s32 %v3931_v29 }
 0x308   : > { %v1521_v11 = vsel %vm1498_vm5, %v1488_v22, 0.0  ;;  %v1192_v9 = vshll.u32 %v1191_v44, 16  ;;  %v1424_v51 = vsel %vm1399_vm3, %v554_v16, %v3223_v53  ;;  %v965_v14 = vcvt.f32.s32 %v3260_v33 }
 0x309   : > { %v1489_v41 = vsel %vm1465_vm4, %v1456_v56, %v3932_v32  ;;  %v982_v12 = vshll.u32 %v981_v43, 16  ;;  %v1457_v46 = vsel %vm1432_vm0, %v1424_v51, %v1263_v58  ;;  %v1163_v63 = vadd.s32 %v1162_v1, %v1160_v17  ;;  %v3935_v17 = vld [vmem:[#allocation64_spill] sm:$0xff] }
 0x30a   : > { %v3391_v60 = vpop.xlane.xlu0 %1233  ;;  %v1358_v28 = vpop.permute.xlu1 %1357  ;;  %v1264_v57 = vcvt.s32.f32 %v1148_v38  ;;  %v997_v18 = vshll.u32 %v996_v24, 16  ;;  %v1250_v6 = vcvt.s32.f32 %v938_v31  ;;  %v953_v22 = vadd.s32 %v952_v61, %v950_v15  ;;  %v3936_v24 = vld [vmem:[#allocation65_spill] sm:$0xff] }
 0x30b   : > { %1601 = vxpose.xlu1.b32.cont [6/16] (narrow) %v1553_v5, 8  ;;  %v1554_v44 = vsel %vm1531_vm6, %v1521_v11, 0.0  ;;  %v3933_v53 = vsub.f32 %v3912_v23, %v3827_v8  ;;  %v1175_v2 = vcvt.f32.s32 %v3360_v10  ;;  %v3934_v42 = vsub.f32 %v3082_v35, %v3860_v55 }
 0x30c   : > { %v1522_v43 = vsel %vm1498_vm5, %v1489_v41, 0.0  ;;  %v968_v61 = vadd.s32 %v967_v50, %v965_v14  ;;  %v980_v58 = vcvt.f32.s32 %v3262_v45  ;;  %v1490_v8 = vsel %vm1465_vm4, %v1457_v46, %v3935_v17  ;;  %v3939_v14 = vld [vmem:[#allocation79_spill] sm:$0xff] }
 0x30d   : > { %v1425_v33 = vsel %vm1399_vm3, %v3933_v53, %v3241_v20  ;;  %v1265_v23 = vcvt.s32.f32 %v1163_v63  ;;  %v1190_v10 = vcvt.f32.s32 %v3358_v48  ;;  %v3937_v55 = vsub.f32 %v3351_v30, %v3918_v26 }
 0x30e   : > { %v1326_v47 = vpop.permute.xlu0 %1325  ;;  %v1458_v20 = vsel %vm1432_vm0, %v1425_v33, %v1264_v57  ;;  %v1360_v38 = vpop.permute.xlu1 %1359  ;;  %v1251_v50 = vcvt.s32.f32 %v953_v22  ;;  %v1555_v31 = vsel %vm1531_vm6, %v1522_v43, 0.0  ;;  %v1178_v1 = vadd.s32 %v1177_v49, %v1175_v2  ;;  %v3943_v2 = vld [vmem:[#allocation66_spill] sm:$0xff] }
 0x30f   : > { %1602 = vxpose.xlu1.b32.cont [7/16] (narrow) %v1554_v44, 8  ;;  %v1411_v16 = vsel %vm1399_vm3, %v3934_v42, %v1326_v47  ;;  %v1426_v45 = vsel %vm1399_vm3, %v3937_v55, %v3254_v59  ;;  %v3938_v48 = vsub.f32 %v3094_v52, %v3863_v39  ;;  %v1523_v51 = vsel %vm1498_vm5, %v1490_v8, 0.0  ;;  %v3940_v52 = vld [vmem:[#allocation54_spill] sm:$0xff] }
 0x310   : > { %v1444_v56 = vsel %vm1432_vm0, %v1411_v16, %v1250_v6  ;;  %v1252_v30 = vcvt.s32.f32 %v968_v61  ;;  %v983_v26 = vadd.s32 %v982_v12, %v980_v58  ;;  %v1491_v32 = vsel %vm1465_vm4, %v1458_v20, %v3939_v14 }
 0x311   : > { %v1477_v35 = vsel %vm1465_vm4, %v1444_v56, %v3936_v24  ;;  %v995_v49 = vcvt.f32.s32 %v3267_v0  ;;  %v1459_v41 = vsel %vm1432_vm0, %v1426_v45, %v1265_v23  ;;  %v1193_v46 = vadd.s32 %v1192_v9, %v1190_v10  ;;  %v3947_v24 = vld [vmem:[#allocation42_spill] sm:$0xff]  ;;  %v3950_v45 = vld [vmem:[#allocation81_spill] sm:$0xff] }
 0x312   : > { %v1328_v15 = vpop.permute.xlu0 %1327  ;;  %v1510_v5 = vsel %vm1498_vm5, %v1477_v35, 0.0  ;;  %v1205_v63 = vcvt.f32.s32 %v3375_v4  ;;  %v3941_v57 = vsub.f32 %v3061_v19, %v3855_v62  ;;  %v1556_v6 = vsel %vm1531_vm6, %v1523_v51, 0.0  ;;  %v1362_v0 = vpop.permute.xlu1 %1361 }
 0x313   : > { %1603 = vxpose.xlu1.b32.cont [8/16] (narrow) %v1555_v31, 8  ;;  %v1412_v29 = vsel %vm1399_vm3, %v3938_v48, %v1328_v15  ;;  %v1543_v11 = vsel %vm1531_vm6, %v1510_v5, 0.0  ;;  %v1266_v47 = vcvt.s32.f32 %v1178_v1  ;;  %v3942_v9 = vsub.f32 %v3108_v21, %v3866_v40  ;;  %v3944_v21 = vld [vmem:[#allocation67_spill] sm:$0xff]  ;;  %v3951_v5 = vld [vmem:[#allocation56_spill] sm:$0xff] }
 0x314   : > { %v1445_v59 = vsel %vm1432_vm0, %v1412_v29, %v1251_v50  ;;  %1575 = vxpose.xlu0.b32.cont [12/16] (narrow) %v1543_v11, 8  ;;  %v1427_v12 = vsel %vm1399_vm3, %v3941_v57, %v1358_v28  ;;  %v1524_v33 = vsel %vm1498_vm5, %v1491_v32, 0.0  ;;  %v1222_v19 = vshll.u32 %v1221_v3, 16 }
 0x315   : > { %v1478_v39 = vsel %vm1465_vm4, %v1445_v59, %v3940_v52  ;;  %v1253_v62 = vcvt.s32.f32 %v983_v26  ;;  %v1492_v42 = vsel %vm1465_vm4, %v1459_v41, %v3943_v2  ;;  %v998_v16 = vadd.s32 %v997_v18, %v995_v49  ;;  %v3953_v41 = vld [vmem:[#allocation48_spill] sm:$0xff] }
 0x316   : > { %v1330_v22 = vpop.permute.xlu0 %1329  ;;  %v1511_v44 = vsel %vm1498_vm5, %v1478_v39, 0.0  ;;  %v1220_v43 = vcvt.f32.s32 %v3373_v27  ;;  %v1460_v61 = vsel %vm1432_vm0, %v1427_v12, %v1266_v47  ;;  %v1208_v58 = vadd.s32 %v3393_v34, %v1205_v63  ;;  %v3955_v63 = vld [vmem:[#allocation68_spill] sm:$0xff] }
 0x317   : > { %1604 = vxpose.xlu1.b32.cont [9/16] (narrow) %v1556_v6, 8  ;;  %v1413_v53 = vsel %vm1399_vm3, %v3942_v9, %v1330_v22  ;;  %v1544_v4 = vsel %vm1531_vm6, %v1511_v44, 0.0  ;;  %v3945_v3 = vsub.f32 %v3922_v36, %v3921_v13  ;;  %v1557_v17 = vsel %vm1531_vm6, %v1524_v33, 0.0  ;;  %v3948_v13 = vld [vmem:[#allocation85_spill] sm:$0xff]  ;;  %v3956_v6 = vld [vmem:[#allocation70_spill] sm:$0xff]  ;;  %v3957_v33 = vld [vmem:[#allocation44_spill] sm:$0xff] }
 0x318   : > { %v1446_v28 = vsel %vm1432_vm0, %v1413_v53, %v1252_v30  ;;  %1576 = vxpose.xlu0.b32.cont [13/16] (narrow) %v1544_v4, 8  ;;  %v1267_v18 = vcvt.s32.f32 %v1193_v46  ;;  %v3946_v27 = vsub.f32 %v3117_v7, %v3867_v25  ;;  %v1525_v34 = vsel %vm1498_vm5, %v1492_v42, 0.0  ;;  %v1364_v25 = vpop.permute.xlu1 %1363  ;;  %v3954_v46 = vld [vmem:[#allocation86_spill] sm:$0xff] }
 0x319   : > { %v1479_v40 = vsel %vm1465_vm4, %v1446_v28, %v3944_v21  ;;  %v1428_v56 = vsel %vm1399_vm3, %v3945_v3, %v1360_v38  ;;  %v559_v36 = vsub.f32 %v3948_v13, %v3947_v24  ;;  %v3949_v38 = vld [vmem:[#allocation82_spill] sm:$0xff]  ;;  %v1493_v50 = vsel %vm1465_vm4, %v1460_v61, %v3950_v45  ;;  %v3959_v28 = vld [vmem:[#allocation83_spill] sm:$0xff] }
 0x31a   : > { %v1332_v8 = vpop.permute.xlu0 %1331  ;;  %v1512_v23 = vsel %vm1498_vm5, %v1479_v40, 0.0  ;;  %v1236_v35 = vcvt.f32.s32 %v3949_v38  ;;  %v1254_v31 = vcvt.s32.f32 %v998_v16  ;;  %v1223_v15 = vadd.s32 %v1222_v19, %v1220_v43  ;;  %v3958_v19 = vld [vmem:[#allocation87_spill] sm:$0xff]  ;;  %v3960_v40 = vld [vmem:[#allocation69_spill] sm:$0xff] }
 0x31b   : > { %1605 = vxpose.xlu1.b32.cont [10/16] (narrow) %v1557_v17, 8  ;;  %v1414_v20 = vsel %vm1399_vm3, %v3946_v27, %v1332_v8  ;;  %v1545_v10 = vsel %vm1531_vm6, %v1512_v23, 0.0  ;;  %v1461_v7 = vsel %vm1432_vm0, %v1428_v56, %v1267_v18  ;;  %v1268_v48 = vcvt.s32.f32 %v1208_v58  ;;  %v3961_v8 = vld [vmem:[#allocation84_spill] sm:$0xff] }
 0x31c   : > { %v1447_v55 = vsel %vm1432_vm0, %v1414_v20, %v1253_v62  ;;  %1577 = vxpose.xlu0.b32.cont [14/16] (narrow) %v1545_v10, 8  ;;  %v1429_v29 = vsel %vm1399_vm3, %v559_v36, %v1362_v0  ;;  %v1558_v11 = vsel %vm1531_vm6, %v1525_v34, 0.0  ;;  %v1235_v26 = vcvt.f32.s32 %v3391_v60  ;;  %v1366_v9 = vpop.permute.xlu1 %1365 }
 0x31d   : > { %v1480_v1 = vsel %vm1465_vm4, %v1447_v55, %v3951_v5  ;;  %v3952_v59 = vsub.f32 %v3123_v54, %v3868_v37  ;;  %v1526_v49 = vsel %vm1498_vm5, %v1493_v50, 0.0  ;;  %v560_v52 = vsub.f32 %v3954_v46, %v3953_v41 }
 0x31e   : > { %v1334_v51 = vpop.permute.xlu0 %1333  ;;  %v1513_v30 = vsel %vm1498_vm5, %v1480_v1, 0.0  ;;  %v1494_v57 = vsel %vm1465_vm4, %v1461_v7, %v3955_v63  ;;  %v1237_v60 = vshll.u32 %v1236_v35, 16  ;;  %v1462_v12 = vsel %vm1432_vm0, %v1429_v29, %v1268_v48 }
 0x31f   : > { %1606 = vxpose.xlu1.b32.cont [11/16] (narrow) %v1558_v11, 8  ;;  %v1415_v14 = vsel %vm1399_vm3, %v3952_v59, %v1334_v51  ;;  %v1546_v32 = vsel %vm1531_vm6, %v1513_v30, 0.0  ;;  %v1430_v37 = vsel %vm1399_vm3, %v560_v52, %v1364_v25  ;;  %v1559_v22 = vsel %vm1531_vm6, %v1526_v49, 0.0 }
 0x320   : > { %v1448_v39 = vsel %vm1432_vm0, %v1415_v14, %v1254_v31  ;;  %1578 = vxpose.xlu0.b32.cont [15/16] (narrow) %v1546_v32, 8  ;;  %v1269_v47 = vcvt.s32.f32 %v1223_v15  ;;  %v1238_v0 = vadd.s32 %v1237_v60, %v1235_v26  ;;  %v1527_v4 = vsel %vm1498_vm5, %v1494_v57, 0.0 }
 0x321   : > { %v1481_v54 = vsel %vm1465_vm4, %v1448_v39, %v3956_v6  ;;  %v561_v62 = vsub.f32 %v3958_v19, %v3957_v33  ;;  %v1495_v2 = vsel %vm1465_vm4, %v1462_v12, %v3959_v28  ;;  %v1560_v43 = vsel %vm1531_vm6, %v1527_v4, 0.0 }
 0x322   : > { %v1514_v44 = vsel %vm1498_vm5, %v1481_v54, 0.0  ;;  %v1463_v42 = vsel %vm1432_vm0, %v1430_v37, %v1269_v47  ;;  %v1270_v61 = vcvt.s32.f32 %v1238_v0  ;;  %v1528_v21 = vsel %vm1498_vm5, %v1495_v2, 0.0 }
 0x323   : > { %1607 = vxpose.xlu1.b32.cont [12/16] (narrow) %v1559_v22, 8  ;;  %v1547_v53 = vsel %vm1531_vm6, %v1514_v44, 0.0  ;;  %v1431_v16 = vsel %vm1399_vm3, %v561_v62, %v1366_v9  ;;  %v1496_v58 = vsel %vm1465_vm4, %v1463_v42, %v3960_v40  ;;  %v1561_v56 = vsel %vm1531_vm6, %v1528_v21, 0.0 }
 0x324   : > { %1579 = vxpose.xlu0.b32.end [16/16] (narrow) %v1547_v53, 8  ;;  %v1464_v3 = vsel %vm1432_vm0, %v1431_v16, %v1270_v61  ;;  %v1529_v17 = vsel %vm1498_vm5, %v1496_v58, 0.0 }
 0x325   : > { %v1497_v23 = vsel %vm1465_vm4, %v1464_v3, %v3961_v8  ;;  %v1562_v18 = vsel %vm1531_vm6, %v1529_v17, 0.0 }
 0x326   : > { %v1530_v27 = vsel %vm1498_vm5, %v1497_v23, 0.0 }
 0x327   : > { %1608 = vxpose.xlu1.b32.cont [13/16] (narrow) %v1560_v43, 8  ;;  %v1563_v20 = vsel %vm1531_vm6, %v1530_v27, 0.0 }
 0x32b   : > { %1609 = vxpose.xlu1.b32.cont [14/16] (narrow) %v1561_v56, 8 }
 0x32f   : > { %1610 = vxpose.xlu1.b32.cont [15/16] (narrow) %v1562_v18, 8 }
 0x333   : > { %1611 = vxpose.xlu1.b32.end [16/16] (narrow) %v1563_v20, 8 }
 0x368   : > { %v1580_v10 = vpop.trf.xlu0 }
 0x369   : > { %1628 = vst [vmem:[%s134_s30] sm:$0xff] %v1580_v10 }
 0x377   : > { %v1612_v34 = vpop.trf.xlu1 }
 0x378   : > { %1629 = vst [vmem:[%s134_s30 + $0x8] sm:$0xff] %v1612_v34 }
 0x379   : > { %1844 = shalt.err (!%p1841_p5)
}
 0x37a   : > { %s1845_s21 = scalar_lea.hbm %s3536_s12, 256  ;;  %s1849_s24 = scalar_lea.hbm %s3582_s1, 512 }
 0x37b   : > { %p1846_p6 = scmp.ne.s32.totalorder %s3536_s12, %s1845_s21  ;;  %p1850_p10 = scmp.lt.u32.totalorder %s3536_s12, %s3582_s1 }
 0x37c   : > { %p1851_p11 = scmp.lt.u32.totalorder %s1849_s24, %s1845_s21  ;;  %p1853_p13 = scmp.lt.u32.totalorder %s1845_s21, %s3536_s12 }
 0x37d   : > { %p1847_p7 = pnand %p1846_p6, %p1966_p4 }
 0x37e   : > { %p1852_p12 = por %p1851_p11, %p1850_p10 }
 0x37f   : > { %p1848_p9 = pneg %p1847_p7 }
 0x380   : > { %p1854_p0 = por %p1853_p13, %p1852_p12 }
 0x382   : > { %p1855_p1 = pnand %p1854_p0, %p1848_p9 }
 0x384   : > { %1858 = shalt.err (!%p1855_p1)
}
 0x385   : > { %1738 = dma.vmem_to_hbm [thread:$0]  (%p1966_p4), %s3531_s2, 256, %s3536_s12, %s1631_s13  }
 0x386 PF: > { %p1744_p2 = scmp.ge.s32.totalorder %s1909_s11, 2  ;;  %s1659_s27 = sand.u32 1, %s1889_s6  }
 0x387   : > { %s1660_s28 = scalar_lea.sflag [#allocation3], %s1659_s27 }
 0x388   : > { %p1741_p3 = pnand %p1744_p2, %p1973_p8 }
 0x38a   : > { %1884 = dma.done.wait (!%p1741_p3), %s1660_s28, 256  }
 0x38b   : > { %1886 = vsyncadd (!%p1741_p3), %s1660_s28, 4294967040  ;;  %s14_s11 = sadd.s32 1, %s1909_s11   ;;  %s3962_s6 = smov %s1893_s7 }
 0x38c   : > { %p11_p5 = scmp.ge.s32.totalorder %s14_s11, 4   ;;  %s3963_s7 = smov %s1897_s8 }
 0x38d   : > { %s3964_s8 = smov %s1979_s19  ;;  %s3965_s9 = smov %s1905_s10 }
 0x38e   : > { %s3966_s10 = smov %s3968_s14  ;;  %13 = sbr.rel (!%p11_p5) target bundleno = 4 (0x4), region = 59 }
 0x395   :  { %1665 = vsyncpa [#allocation3], 1 }
 0x396   :  { %1667 = vsyncpa [#allocation3 + $0x1], 1 }

</bundles_post_ra>
